<compile_context>
chip_gen: v7x
topology: tpu7x:2x2x1
jax: 0.10.0
libtpu: 0.0.40
codegen_flags: <defaults>
</compile_context>

<pallas_src>
import jax
import jax.numpy as jnp
from jax import lax
from jax.experimental import pallas as pl
from jax.experimental.pallas import tpu as pltpu

IN_FEATURES = 1024
OUT_FEATURES = 512


def linear_kernel(x_ref, w_ref, b_ref, o_ref):
    # x_ref: (tm, K), w_ref: (N, K)  -> contract last dims of both (y = x @ W^T).
    y = lax.dot_general(
        x_ref[...],
        w_ref[...],
        dimension_numbers=(((1,), (1,)), ((), ())),
        preferred_element_type=jnp.float32,
    )
    o_ref[...] = (y + b_ref[...]).astype(o_ref.dtype)


def mlp1_forward(x, w, b, *, tm=None):
    """y = x @ w.T + b, with w in PyTorch (out_features, in_features) layout."""
    M, K = x.shape
    N, K2 = w.shape
    assert K == K2, "weight in_features mismatch"
    assert b.shape == (N,)

    if tm is None:
        # Full batch in one tile when small; otherwise 512-row tiles (ragged tail
        # handled by pl.cdiv grid + Pallas block masking).
        tm = M if M <= 512 else 512

    b2d = b.reshape(1, N)  # broadcast along rows inside the kernel
    grid = (pl.cdiv(M, tm),)

    return pl.pallas_call(
        linear_kernel,
        out_shape=jax.ShapeDtypeStruct((M, N), x.dtype),
        grid_spec=pltpu.PrefetchScalarGridSpec(
            num_scalar_prefetch=0,
            grid=grid,
            in_specs=[
                pl.BlockSpec((tm, K), lambda i: (i, 0)),   # streamed x tile
                pl.BlockSpec((N, K), lambda i: (0, 0)),    # whole weight, VMEM-resident
                pl.BlockSpec((1, N), lambda i: (0, 0)),    # bias, VMEM-resident
            ],
            out_specs=pl.BlockSpec((tm, N), lambda i: (i, 0)),  # lane-dense (512 = 4*128)
        ),
        compiler_params=pltpu.CompilerParams(
            dimension_semantics=("parallel",),  # shards batch tiles across TCs on v7x
        ),
    )(x, w, b2d)


if __name__ == "__main__":
    key = jax.random.PRNGKey(0)
    kx, kw, kb = jax.random.split(key, 3)

    batch = 8
    x = jax.random.normal(kx, (batch, IN_FEATURES), dtype=jnp.float32)

    # Deterministic parameter init in PyTorch's (out, in) layout:
    # U(-1/sqrt(in_features), 1/sqrt(in_features)).
    bound = 1.0 / (IN_FEATURES ** 0.5)
    w = jax.random.uniform(
        kw, (OUT_FEATURES, IN_FEATURES), minval=-bound, maxval=bound, dtype=jnp.float32
    )
    b = jax.random.uniform(
        kb, (OUT_FEATURES,), minval=-bound, maxval=bound, dtype=jnp.float32
    )

    y = mlp1_forward(x, w, b)
    jax.block_until_ready(y)

    # Reference check against plain JAX (same math as torch.nn.Linear).
    y_ref = x @ w.T + b
    assert y.shape == (batch, OUT_FEATURES)
    assert jnp.allclose(y, y_ref, atol=1e-4, rtol=1e-4)

    print("KERNEL_OK")
</pallas_src>

<mosaic_0001>
module attributes {stable_mosaic.version = 11 : i64} {
  func.func @linear_kernel(%arg0: i32, %arg1: memref<8x1024xf32, #tpu.memory_space<vmem>>, %arg2: memref<512x1024xf32, #tpu.memory_space<vmem>>, %arg3: memref<1x512xf32, #tpu.memory_space<vmem>>, %arg4: memref<8x512xf32, #tpu.memory_space<vmem>>) attributes {dimension_semantics = [#tpu.dimension_semantics<parallel>], iteration_bounds = array<i64: 1>, scalar_prefetch = 0 : i64, scratch_operands = 0 : i64, tpu.core_type = #tpu.core_type<tc>, window_params = [{transform_indices = @transform_0, window_bounds = array<i64: 8, 1024>}, {pipeline_mode = #tpu.pipeline_mode<synchronous>, transform_indices = @transform_1, window_bounds = array<i64: 512, 1024>}, {pipeline_mode = #tpu.pipeline_mode<synchronous>, transform_indices = @transform_2, window_bounds = array<i64: 1, 512>}, {transform_indices = @transform_3, window_bounds = array<i64: 8, 512>}]} {
    %c0 = arith.constant 0 : index
    %c0_0 = arith.constant 0 : index
    %0 = vector.load %arg1[%c0, %c0_0] : memref<8x1024xf32, #tpu.memory_space<vmem>>, vector<8x1024xf32>
    %c0_1 = arith.constant 0 : index
    %c0_2 = arith.constant 0 : index
    %1 = vector.load %arg2[%c0_1, %c0_2] : memref<512x1024xf32, #tpu.memory_space<vmem>>, vector<512x1024xf32>
    %cst = arith.constant dense<0.000000e+00> : vector<8x512xf32>
    %2 = tpu.matmul %0, %1, %cst {dimension_numbers = #tpu.dot_dimension_numbers<[1], [1], [0], [0], [0, 0, 1, 0], [], []>} : vector<8x1024xf32>, vector<512x1024xf32>, vector<8x512xf32> -> vector<8x512xf32>
    %c0_3 = arith.constant 0 : index
    %c0_4 = arith.constant 0 : index
    %3 = vector.load %arg3[%c0_3, %c0_4] : memref<1x512xf32, #tpu.memory_space<vmem>>, vector<1x512xf32>
    %4 = vector.broadcast %3 : vector<1x512xf32> to vector<8x512xf32>
    %5 = arith.addf %2, %4 : vector<8x512xf32>
    %c0_5 = arith.constant 0 : index
    %c0_6 = arith.constant 0 : index
    %6 = vector.load %arg4[%c0_5, %c0_6] : memref<8x512xf32, #tpu.memory_space<vmem>>, vector<8x512xf32>
    tpu.vector_store %arg4[%c0_5, %c0_6], %5 {strides = array<i32>} : memref<8x512xf32, #tpu.memory_space<vmem>>, vector<8x512xf32>,
    return
  }
  func.func @transform_0(%arg0: i32) -> (i32, i32) {
    %c0_i32 = arith.constant 0 : i32
    %c0_i32_0 = arith.constant 0 : i32
    return %arg0, %c0_i32 : i32, i32
  }
  func.func @transform_1(%arg0: i32) -> (i32, i32) {
    %c0_i32 = arith.constant 0 : i32
    %c0_i32_0 = arith.constant 0 : i32
    %c0_i32_1 = arith.constant 0 : i32
    return %c0_i32, %c0_i32_0 : i32, i32
  }
  func.func @transform_2(%arg0: i32) -> (i32, i32) {
    %c0_i32 = arith.constant 0 : i32
    %c0_i32_0 = arith.constant 0 : i32
    %c0_i32_1 = arith.constant 0 : i32
    return %c0_i32, %c0_i32_0 : i32, i32
  }
  func.func @transform_3(%arg0: i32) -> (i32, i32) {
    %c0_i32 = arith.constant 0 : i32
    %c0_i32_0 = arith.constant 0 : i32
    return %arg0, %c0_i32 : i32, i32
  }
}

</mosaic_0001>

<bundles_post_ra>
// kernel: tpu_custom_call.1
= control target key start
LH: loop header
LB: loop body
LE: loop exit
PB: predicated region body
PF: predicated region fallthrough
CT: control target
= control target key end

     0   :  { %8 = vsyncpa [#allocation3], 0  ;;  %s1884_s0 = inlined_call_operand.hbm [shape: f32[8,1024], index: 0, kind: input, shape index: {}]   ;;  %s1885_s1 = inlined_call_operand.hbm [shape: f32[512,1024], index: 1, kind: input, shape index: {}]   ;;  %s1886_s2 = inlined_call_operand.hbm [shape: f32[1,512], index: 2, kind: input, shape index: {}]   ;;  %s1887_s3 = inlined_call_operand.hbm [shape: f32[8,512], index: 3, kind: output, shape index: {}]  }
   0x1   :  { %9 = vsyncpa [#allocation6], 0 }
   0x2   :  { %10 = vsyncpa [#allocation4], 0  ;;  %s1810_s12 = smov [#allocation5]   ;;  %s1716_s16 = scalar_lea.hbm %s1885_s1, 65536 }
   0x3   :  { %s26_s13 = sshll.u32 %s1810_s12, 4  ;;  %p1717_p0 = scmp.ne.s32.totalorder %s1885_s1, %s1716_s16  ;;  %s27_s13 = int_to_ptr.vmem [resolvable:$true] %s26_s13 }
   0x4   :  { %p1720_p1 = scmp.lt.u32.totalorder %s1716_s16, %s1885_s1 }
   0x6   :  { %p1722_p2 = pnand %p1720_p1, %p1717_p0 }
   0x8   :  { %1725 = shalt.err (!%p1722_p2)
}
   0x9   :  { %s1726_s21 = scalar_lea.vmem %s27_s13, 65536  ;;  %p1731_p4 = scmp.lt.s32.totalorder %s27_s13, %s27_s13 }
   0xa   :  { %p1727_p3 = scmp.ne.s32.totalorder %s27_s13, %s1726_s21  ;;  %p1732_p5 = scmp.lt.s32.totalorder %s1726_s21, %s1726_s21 }
   0xc   :  { %p1733_p6 = por %p1732_p5, %p1731_p4 }
   0xe   :  { %p1734_p7 = pnand %p1733_p6, %p1727_p3 }
  0x10   :  { %1737 = shalt.err (!%p1734_p7)
}
  0x11   :  { %s1811_s22 = smov 1024   ;;  %s1812_s23 = smov 64  }
  0x12   :  { %32 = dma.hbm_to_vmem [thread:$0]  %s1885_s1, 65536, %s27_s13, [#allocation6], %s1811_s22, %s1811_s22, %s1812_s23  }
  0x13   :  { %s1813_s26 = smov [#allocation2]   ;;  %s1814_s28 = smov [#allocation7]  }
  0x14   :  { %s17_s27 = sshll.u32 %s1813_s26, 4  ;;  %s39_s29 = sshll.u32 %s1814_s28, 4  ;;  %s18_s27 = int_to_ptr.vmem [resolvable:$true] %s17_s27  ;;  %s40_s29 = int_to_ptr.vmem [resolvable:$true] %s39_s29 }
  0x15   :  { %s1738_s5 = scalar_lea.hbm %s1884_s0, 1024 }
  0x16   :  { %p1739_p8 = scmp.ne.s32.totalorder %s1884_s0, %s1738_s5  ;;  %p1742_p9 = scmp.lt.u32.totalorder %s1738_s5, %s1884_s0 }
  0x18   :  { %p1744_p10 = pnand %p1742_p9, %p1739_p8 }
  0x1a   :  { %1747 = shalt.err (!%p1744_p10)
}
  0x1b   :  { %s1748_s1 = scalar_lea.vmem %s18_s27, 1024  ;;  %p1753_p12 = scmp.lt.s32.totalorder %s18_s27, %s18_s27 }
  0x1c   :  { %p1749_p11 = scmp.ne.s32.totalorder %s18_s27, %s1748_s1  ;;  %p1754_p13 = scmp.lt.s32.totalorder %s1748_s1, %s1748_s1 }
  0x1e   :  { %p1755_p0 = por %p1754_p13, %p1753_p12 }
  0x20   :  { %p1756_p1 = pnand %p1755_p0, %p1749_p11 }
  0x22   :  { %1759 = shalt.err (!%p1756_p1)
}
  0x23   :  { %20 = dma.hbm_to_vmem [thread:$0]  %s1884_s0, 1024, %s18_s27, [#allocation3]  }
  0x24   :  { %s1760_s14 = scalar_lea.hbm %s1886_s2, 64 }
  0x25   :  { %p1761_p2 = scmp.ne.s32.totalorder %s1886_s2, %s1760_s14  ;;  %p1764_p3 = scmp.lt.u32.totalorder %s1760_s14, %s1886_s2 }
  0x27   :  { %p1766_p4 = pnand %p1764_p3, %p1761_p2 }
  0x29   :  { %1769 = shalt.err (!%p1766_p4)
}
  0x2a   :  { %s1770_s19 = scalar_lea.vmem %s40_s29, 64  ;;  %p1775_p6 = scmp.lt.s32.totalorder %s40_s29, %s40_s29 }
  0x2b   :  { %p1771_p5 = scmp.ne.s32.totalorder %s40_s29, %s1770_s19  ;;  %p1776_p7 = scmp.lt.s32.totalorder %s1770_s19, %s1770_s19 }
  0x2d   :  { %p1777_p8 = por %p1776_p7, %p1775_p6 }
  0x2f   :  { %p1778_p9 = pnand %p1777_p8, %p1771_p5 }
  0x31   :  { %1781 = shalt.err (!%p1778_p9)
}
  0x32   :  { %42 = dma.hbm_to_vmem [thread:$0]  %s1886_s2, 64, %s40_s29, [#allocation6]  }
  0x33   :  { %1804 = dma.done.wait [#allocation3], 1024  }
  0x34   :  { %1805 = vsyncadd [#allocation3], 4294966272 }
  0x35   :  { %1806 = dma.done.wait [#allocation6], 65600  }
  0x36   :  { %1807 = vsyncadd [#allocation6], 4294901696  ;;  %v61_v0 = vld [vmem:[#allocation5 + $0x8] sm:$0xff]  ;;  %v60_v5 = vld [vmem:[#allocation5] sm:$0xff]  ;;  %s1815_s2 = smov [#allocation8]  }
  0x37   :  { %v69_v1 = vld [vmem:[#allocation5 + $0x48] sm:$0xff]  ;;  %v68_v6 = vld [vmem:[#allocation5 + $0x40] sm:$0xff]  ;;  %s1172_s21 = sshll.u32 %s1815_s2, 4  ;;  %s1173_s21 = int_to_ptr.vmem [resolvable:$true] %s1172_s21 }
  0x38   :  { %v317_v2 = vld [vmem:[#allocation5 + $0x808] sm:$0xff]  ;;  %v1182_v3 = vpack.c.bf16 %v69_v1, %v61_v0  ;;  %v1184_v8 = vpack.c.bf16 %v68_v6, %v60_v5  ;;  %v316_v9 = vld [vmem:[#allocation5 + $0x800] sm:$0xff]  ;;  %s1782_s22 = scalar_lea.vmem %s1173_s21, 512  ;;  %p1787_p11 = scmp.lt.s32.totalorder %s1173_s21, %s1173_s21 }
  0x39   :  { %v325_v4 = vld [vmem:[#allocation5 + $0x848] sm:$0xff]  ;;  %v324_v10 = vld [vmem:[#allocation5 + $0x840] sm:$0xff]  ;;  %p1783_p10 = scmp.ne.s32.totalorder %s1173_s21, %s1782_s22  ;;  %p1788_p12 = scmp.lt.s32.totalorder %s1782_s22, %s1782_s22 }
  0x3a   :  { %v1438_v7 = vpack.c.bf16 %v325_v4, %v317_v2  ;;  %v77_v11 = vld [vmem:[#allocation5 + $0x88] sm:$0xff]  ;;  %1183 = vmatprep.subr.bf16.mxu0 %v1182_v3  ;;  %v1440_v12 = vpack.c.bf16 %v324_v10, %v316_v9  ;;  %v76_v18 = vld [vmem:[#allocation5 + $0x80] sm:$0xff] }
  0x3b   :  { %v85_v13 = vld [vmem:[#allocation5 + $0xc8] sm:$0xff]  ;;  %1185 = vmatpush1.bf16.xpose.msra.mxu0 %v1184_v8  ;;  %v84_v19 = vld [vmem:[#allocation5 + $0xc0] sm:$0xff]  ;;  %p1789_p13 = por %p1788_p12, %p1787_p11 }
  0x3c   :  { %v333_v14 = vld [vmem:[#allocation5 + $0x888] sm:$0xff]  ;;  %1439 = vmatprep.subr.bf16.mxu1 %v1438_v7  ;;  %v1186_v16 = vpack.c.bf16 %v85_v13, %v77_v11  ;;  %v332_v20 = vld [vmem:[#allocation5 + $0x880] sm:$0xff]  ;;  %v1188_v26 = vpack.c.bf16 %v84_v19, %v76_v18 }
  0x3d   :  { %v341_v15 = vld [vmem:[#allocation5 + $0x8c8] sm:$0xff]  ;;  %1441 = vmatpush1.bf16.xpose.msra.mxu1 %v1440_v12  ;;  %v340_v21 = vld [vmem:[#allocation5 + $0x8c0] sm:$0xff]  ;;  %p1790_p0 = pnand %p1789_p13, %p1783_p10 }
  0x3e   :  { %v1442_v17 = vpack.c.bf16 %v341_v15, %v333_v14  ;;  %1187 = vmatprep.subr.bf16.mxu0 %v1186_v16  ;;  %v93_v22 = vld [vmem:[#allocation5 + $0x108] sm:$0xff]  ;;  %v1444_v27 = vpack.c.bf16 %v340_v21, %v332_v20  ;;  %v92_v30 = vld [vmem:[#allocation5 + $0x100] sm:$0xff] }
  0x3f   :  { %v101_v23 = vld [vmem:[#allocation5 + $0x148] sm:$0xff]  ;;  %v100_v31 = vld [vmem:[#allocation5 + $0x140] sm:$0xff] }
  0x40   :  { %1443 = vmatprep.subr.bf16.mxu1 %v1442_v17  ;;  %v349_v24 = vld [vmem:[#allocation5 + $0x908] sm:$0xff]  ;;  %v1190_v28 = vpack.c.bf16 %v101_v23, %v93_v22  ;;  %v348_v32 = vld [vmem:[#allocation5 + $0x900] sm:$0xff]  ;;  %v1192_v38 = vpack.c.bf16 %v100_v31, %v92_v30 }
  0x41   :  { %v357_v25 = vld [vmem:[#allocation5 + $0x948] sm:$0xff]  ;;  %v356_v33 = vld [vmem:[#allocation5 + $0x940] sm:$0xff] }
  0x42   :  { %v1446_v29 = vpack.c.bf16 %v357_v25, %v349_v24  ;;  %v109_v34 = vld [vmem:[#allocation5 + $0x188] sm:$0xff]  ;;  %v1448_v39 = vpack.c.bf16 %v356_v33, %v348_v32  ;;  %v108_v42 = vld [vmem:[#allocation5 + $0x180] sm:$0xff] }
  0x43   :  { %1189 = vmatpush1.bf16.xpose.msra.mxu0 %v1188_v26  ;;  %v117_v35 = vld [vmem:[#allocation5 + $0x1c8] sm:$0xff]  ;;  %v116_v43 = vld [vmem:[#allocation5 + $0x1c0] sm:$0xff] }
  0x44   :  { %1191 = vmatprep.subr.bf16.mxu0 %v1190_v28  ;;  %v365_v36 = vld [vmem:[#allocation5 + $0x988] sm:$0xff]  ;;  %v1194_v40 = vpack.c.bf16 %v117_v35, %v109_v34  ;;  %v364_v44 = vld [vmem:[#allocation5 + $0x980] sm:$0xff]  ;;  %v1196_v50 = vpack.c.bf16 %v116_v43, %v108_v42 }
  0x45   :  { %1445 = vmatpush1.bf16.xpose.msra.mxu1 %v1444_v27  ;;  %v373_v37 = vld [vmem:[#allocation5 + $0x9c8] sm:$0xff]  ;;  %v372_v45 = vld [vmem:[#allocation5 + $0x9c0] sm:$0xff] }
  0x46   :  { %1447 = vmatprep.subr.bf16.mxu1 %v1446_v29  ;;  %v1450_v41 = vpack.c.bf16 %v373_v37, %v365_v36  ;;  %v125_v46 = vld [vmem:[#allocation5 + $0x208] sm:$0xff]  ;;  %v1452_v51 = vpack.c.bf16 %v372_v45, %v364_v44  ;;  %v124_v54 = vld [vmem:[#allocation5 + $0x200] sm:$0xff] }
  0x47   :  { %v133_v47 = vld [vmem:[#allocation5 + $0x248] sm:$0xff]  ;;  %v132_v55 = vld [vmem:[#allocation5 + $0x240] sm:$0xff] }
  0x48   :  { %v381_v48 = vld [vmem:[#allocation5 + $0xa08] sm:$0xff]  ;;  %v1198_v52 = vpack.c.bf16 %v133_v47, %v125_v46  ;;  %v380_v56 = vld [vmem:[#allocation5 + $0xa00] sm:$0xff]  ;;  %v1200_v62 = vpack.c.bf16 %v132_v55, %v124_v54 }
  0x49   :  { %v389_v49 = vld [vmem:[#allocation5 + $0xa48] sm:$0xff]  ;;  %v388_v57 = vld [vmem:[#allocation5 + $0xa40] sm:$0xff] }
  0x4a   :  { %v1454_v53 = vpack.c.bf16 %v389_v49, %v381_v48  ;;  %v141_v58 = vld [vmem:[#allocation5 + $0x288] sm:$0xff]  ;;  %v1456_v63 = vpack.c.bf16 %v388_v57, %v380_v56  ;;  %v140_v2 = vld [vmem:[#allocation5 + $0x280] sm:$0xff] }
  0x4b   :  { %1193 = vmatpush1.bf16.xpose.msra.mxu0 %v1192_v38  ;;  %v149_v59 = vld [vmem:[#allocation5 + $0x2c8] sm:$0xff]  ;;  %v148_v3 = vld [vmem:[#allocation5 + $0x2c0] sm:$0xff] }
  0x4c   :  { %1195 = vmatprep.subr.bf16.mxu0 %v1194_v40  ;;  %v397_v60 = vld [vmem:[#allocation5 + $0xa88] sm:$0xff]  ;;  %v1202_v0 = vpack.c.bf16 %v149_v59, %v141_v58  ;;  %v396_v4 = vld [vmem:[#allocation5 + $0xa80] sm:$0xff]  ;;  %v1204_v10 = vpack.c.bf16 %v148_v3, %v140_v2 }
  0x4d   :  { %1449 = vmatpush1.bf16.xpose.msra.mxu1 %v1448_v39  ;;  %v405_v61 = vld [vmem:[#allocation5 + $0xac8] sm:$0xff]  ;;  %v404_v5 = vld [vmem:[#allocation5 + $0xac0] sm:$0xff] }
  0x4e   :  { %1451 = vmatprep.subr.bf16.mxu1 %v1450_v41  ;;  %v1458_v1 = vpack.c.bf16 %v405_v61, %v397_v60  ;;  %v157_v6 = vld [vmem:[#allocation5 + $0x308] sm:$0xff]  ;;  %v1460_v11 = vpack.c.bf16 %v404_v5, %v396_v4  ;;  %v156_v15 = vld [vmem:[#allocation5 + $0x300] sm:$0xff] }
  0x4f   :  { %v165_v7 = vld [vmem:[#allocation5 + $0x348] sm:$0xff]  ;;  %v164_v16 = vld [vmem:[#allocation5 + $0x340] sm:$0xff] }
  0x50   :  { %v413_v8 = vld [vmem:[#allocation5 + $0xb08] sm:$0xff]  ;;  %v1206_v12 = vpack.c.bf16 %v165_v7, %v157_v6  ;;  %v412_v17 = vld [vmem:[#allocation5 + $0xb00] sm:$0xff]  ;;  %v1208_v23 = vpack.c.bf16 %v164_v16, %v156_v15 }
  0x51   :  { %v421_v9 = vld [vmem:[#allocation5 + $0xb48] sm:$0xff]  ;;  %v420_v18 = vld [vmem:[#allocation5 + $0xb40] sm:$0xff] }
  0x52   :  { %v1462_v13 = vpack.c.bf16 %v421_v9, %v413_v8  ;;  %v53_v14 = vld [vmem:[#allocation2 + $0x8] sm:$0xff]  ;;  %v1464_v24 = vpack.c.bf16 %v420_v18, %v412_v17  ;;  %v172_v27 = vld [vmem:[#allocation5 + $0x380] sm:$0xff] }
  0x53   :  { %1197 = vmatpush1.bf16.xpose.msra.mxu0 %v1196_v50  ;;  %658 = vmatprep.mubr.f32.mxu0 %v53_v14  ;;  %v173_v19 = vld [vmem:[#allocation5 + $0x388] sm:$0xff]  ;;  %v180_v28 = vld [vmem:[#allocation5 + $0x3c0] sm:$0xff] }
  0x54   :  { %1199 = vmatprep.subr.bf16.mxu0 %v1198_v52  ;;  %942 = vmatprep.mubr.f32.mxu1 %v53_v14  ;;  %v181_v20 = vld [vmem:[#allocation5 + $0x3c8] sm:$0xff]  ;;  %v428_v29 = vld [vmem:[#allocation5 + $0xb80] sm:$0xff]  ;;  %v1212_v35 = vpack.c.bf16 %v180_v28, %v172_v27 }
  0x55   :  { %1453 = vmatpush1.bf16.xpose.msra.mxu1 %v1452_v51  ;;  %v429_v21 = vld [vmem:[#allocation5 + $0xb88] sm:$0xff]  ;;  %v1210_v25 = vpack.c.bf16 %v181_v20, %v173_v19  ;;  %v436_v30 = vld [vmem:[#allocation5 + $0xbc0] sm:$0xff] }
  0x56   :  { %1455 = vmatprep.subr.bf16.mxu1 %v1454_v53  ;;  %v437_v22 = vld [vmem:[#allocation5 + $0xbc8] sm:$0xff]  ;;  %v1468_v36 = vpack.c.bf16 %v436_v30, %v428_v29  ;;  %v188_v39 = vld [vmem:[#allocation5 + $0x400] sm:$0xff] }
  0x57   :  { %v1466_v26 = vpack.c.bf16 %v437_v22, %v429_v21  ;;  %v189_v31 = vld [vmem:[#allocation5 + $0x408] sm:$0xff]  ;;  %v196_v40 = vld [vmem:[#allocation5 + $0x440] sm:$0xff] }
  0x58   :  { %v197_v32 = vld [vmem:[#allocation5 + $0x448] sm:$0xff]  ;;  %v444_v41 = vld [vmem:[#allocation5 + $0xc00] sm:$0xff]  ;;  %v1216_v47 = vpack.c.bf16 %v196_v40, %v188_v39 }
  0x59   :  { %v445_v33 = vld [vmem:[#allocation5 + $0xc08] sm:$0xff]  ;;  %v1214_v37 = vpack.c.bf16 %v197_v32, %v189_v31  ;;  %v452_v42 = vld [vmem:[#allocation5 + $0xc40] sm:$0xff] }
  0x5a   :  { %v453_v34 = vld [vmem:[#allocation5 + $0xc48] sm:$0xff]  ;;  %v1472_v48 = vpack.c.bf16 %v452_v42, %v444_v41  ;;  %v204_v51 = vld [vmem:[#allocation5 + $0x480] sm:$0xff] }
  0x5b   :  { %1201 = vmatpush1.bf16.xpose.msra.mxu0 %v1200_v62  ;;  %v1470_v38 = vpack.c.bf16 %v453_v34, %v445_v33  ;;  %v205_v43 = vld [vmem:[#allocation5 + $0x488] sm:$0xff]  ;;  %v212_v52 = vld [vmem:[#allocation5 + $0x4c0] sm:$0xff] }
  0x5c   :  { %1203 = vmatprep.subr.bf16.mxu0 %v1202_v0  ;;  %v213_v44 = vld [vmem:[#allocation5 + $0x4c8] sm:$0xff]  ;;  %v460_v53 = vld [vmem:[#allocation5 + $0xc80] sm:$0xff]  ;;  %v1220_v59 = vpack.c.bf16 %v212_v52, %v204_v51 }
  0x5d   :  { %1457 = vmatpush1.bf16.xpose.msra.mxu1 %v1456_v63  ;;  %v461_v45 = vld [vmem:[#allocation5 + $0xc88] sm:$0xff]  ;;  %v1218_v49 = vpack.c.bf16 %v213_v44, %v205_v43  ;;  %v468_v54 = vld [vmem:[#allocation5 + $0xcc0] sm:$0xff] }
  0x5e   :  { %1459 = vmatprep.subr.bf16.mxu1 %v1458_v1  ;;  %v469_v46 = vld [vmem:[#allocation5 + $0xcc8] sm:$0xff]  ;;  %v1476_v60 = vpack.c.bf16 %v468_v54, %v460_v53  ;;  %v220_v63 = vld [vmem:[#allocation5 + $0x500] sm:$0xff] }
  0x5f   :  { %v1474_v50 = vpack.c.bf16 %v469_v46, %v461_v45  ;;  %v221_v55 = vld [vmem:[#allocation5 + $0x508] sm:$0xff]  ;;  %v228_v0 = vld [vmem:[#allocation5 + $0x540] sm:$0xff] }
  0x60   :  { %v229_v56 = vld [vmem:[#allocation5 + $0x548] sm:$0xff]  ;;  %v476_v1 = vld [vmem:[#allocation5 + $0xd00] sm:$0xff]  ;;  %v1224_v7 = vpack.c.bf16 %v228_v0, %v220_v63  ;;  %v63_v63 = vld [vmem:[#allocation5 + $0x18] sm:$0xff] }
  0x61   :  { %v477_v57 = vld [vmem:[#allocation5 + $0xd08] sm:$0xff]  ;;  %v1222_v61 = vpack.c.bf16 %v229_v56, %v221_v55  ;;  %v484_v2 = vld [vmem:[#allocation5 + $0xd40] sm:$0xff]  ;;  %v71_v0 = vld [vmem:[#allocation5 + $0x58] sm:$0xff] }
  0x62   :  { %v485_v58 = vld [vmem:[#allocation5 + $0xd48] sm:$0xff]  ;;  %v1480_v8 = vpack.c.bf16 %v484_v2, %v476_v1  ;;  %v500_v14 = vld [vmem:[#allocation5 + $0xdc0] sm:$0xff]  ;;  %v319_v1 = vld [vmem:[#allocation5 + $0x818] sm:$0xff] }
  0x63   :  { %1205 = vmatpush1.bf16.xpose.msra.mxu0 %v1204_v10  ;;  %v1478_v62 = vpack.c.bf16 %v485_v58, %v477_v57  ;;  %v237_v3 = vld [vmem:[#allocation5 + $0x588] sm:$0xff]  ;;  %v327_v2 = vld [vmem:[#allocation5 + $0x858] sm:$0xff] }
  0x64   :  { %1207 = vmatprep.subr.bf16.mxu0 %v1206_v12  ;;  %v245_v4 = vld [vmem:[#allocation5 + $0x5c8] sm:$0xff]  ;;  %v244_v12 = vld [vmem:[#allocation5 + $0x5c0] sm:$0xff] }
  0x65   :  { %1461 = vmatpush1.bf16.xpose.msra.mxu1 %v1460_v11  ;;  %v493_v5 = vld [vmem:[#allocation5 + $0xd88] sm:$0xff]  ;;  %v1226_v9 = vpack.c.bf16 %v245_v4, %v237_v3  ;;  %v236_v11 = vld [vmem:[#allocation5 + $0x580] sm:$0xff] }
  0x66   :  { %1463 = vmatprep.subr.bf16.mxu1 %v1462_v13  ;;  %v501_v6 = vld [vmem:[#allocation5 + $0xdc8] sm:$0xff]  ;;  %v492_v13 = vld [vmem:[#allocation5 + $0xd80] sm:$0xff]  ;;  %v1228_v19 = vpack.c.bf16 %v244_v12, %v236_v11  ;;  %v79_v11 = vld [vmem:[#allocation5 + $0x98] sm:$0xff] }
  0x67   :  { %v1482_v10 = vpack.c.bf16 %v501_v6, %v493_v5  ;;  %v253_v15 = vld [vmem:[#allocation5 + $0x608] sm:$0xff]  ;;  %v1484_v20 = vpack.c.bf16 %v500_v14, %v492_v13  ;;  %v1246_v5 = vpack.c.bf16 %v71_v0, %v63_v63  ;;  %v1502_v6 = vpack.c.bf16 %v327_v2, %v319_v1  ;;  %v87_v12 = vld [vmem:[#allocation5 + $0xd8] sm:$0xff] }
  0x68   :  { %v261_v16 = vld [vmem:[#allocation5 + $0x648] sm:$0xff]  ;;  %v335_v13 = vld [vmem:[#allocation5 + $0x898] sm:$0xff] }
  0x69   :  { %v509_v17 = vld [vmem:[#allocation5 + $0xe08] sm:$0xff]  ;;  %v1230_v21 = vpack.c.bf16 %v261_v16, %v253_v15  ;;  %v343_v14 = vld [vmem:[#allocation5 + $0x8d8] sm:$0xff]  ;;  %v52_v15 = vld [vmem:[#allocation2] sm:$0xff] }
  0x6a   :  { %v517_v18 = vld [vmem:[#allocation5 + $0xe48] sm:$0xff]  ;;  %v399_v63 = vld [vmem:[#allocation5 + $0xa98] sm:$0xff] }
  0x6b   :  { %1209 = vmatpush1.bf16.xpose.msra.mxu0 %v1208_v23  ;;  %v1486_v22 = vpack.c.bf16 %v517_v18, %v509_v17  ;;  %v252_v23 = vld [vmem:[#allocation5 + $0x600] sm:$0xff]  ;;  %v269_v27 = vld [vmem:[#allocation5 + $0x688] sm:$0xff]  ;;  %v1250_v18 = vpack.c.bf16 %v87_v12, %v79_v11  ;;  %v407_v0 = vld [vmem:[#allocation5 + $0xad8] sm:$0xff] }
  0x6c   :  { %1211 = vmatprep.subr.bf16.mxu0 %v1210_v25  ;;  %v508_v25 = vld [vmem:[#allocation5 + $0xe00] sm:$0xff]  ;;  %v277_v28 = vld [vmem:[#allocation5 + $0x6c8] sm:$0xff]  ;;  %v415_v11 = vld [vmem:[#allocation5 + $0xb18] sm:$0xff] }
  0x6d   :  { %1465 = vmatpush1.bf16.xpose.msra.mxu1 %v1464_v24  ;;  %v260_v24 = vld [vmem:[#allocation5 + $0x640] sm:$0xff]  ;;  %v525_v29 = vld [vmem:[#allocation5 + $0xe88] sm:$0xff]  ;;  %v1234_v33 = vpack.c.bf16 %v277_v28, %v269_v27  ;;  %v351_v27 = vld [vmem:[#allocation5 + $0x918] sm:$0xff] }
  0x6e   :  { %1467 = vmatprep.subr.bf16.mxu1 %v1466_v26  ;;  %v516_v26 = vld [vmem:[#allocation5 + $0xe40] sm:$0xff]  ;;  %v533_v30 = vld [vmem:[#allocation5 + $0xec8] sm:$0xff]  ;;  %v1232_v31 = vpack.c.bf16 %v260_v24, %v252_v23  ;;  %v334_v23 = vld [vmem:[#allocation5 + $0x890] sm:$0xff] }
  0x6f   :  { %v1488_v32 = vpack.c.bf16 %v516_v26, %v508_v25  ;;  %v1490_v34 = vpack.c.bf16 %v533_v30, %v525_v29  ;;  %v285_v39 = vld [vmem:[#allocation5 + $0x708] sm:$0xff]  ;;  %v342_v24 = vld [vmem:[#allocation5 + $0x8d0] sm:$0xff]  ;;  %v95_v25 = vld [vmem:[#allocation5 + $0x118] sm:$0xff] }
  0x70   :  { %v293_v40 = vld [vmem:[#allocation5 + $0x748] sm:$0xff]  ;;  %v103_v26 = vld [vmem:[#allocation5 + $0x158] sm:$0xff]  ;;  %v1508_v30 = vpack.c.bf16 %v342_v24, %v334_v23 }
  0x71   :  { %v541_v41 = vld [vmem:[#allocation5 + $0xf08] sm:$0xff]  ;;  %v1238_v45 = vpack.c.bf16 %v293_v40, %v285_v39  ;;  %v359_v28 = vld [vmem:[#allocation5 + $0x958] sm:$0xff] }
  0x72   :  { %v549_v42 = vld [vmem:[#allocation5 + $0xf48] sm:$0xff]  ;;  %v367_v39 = vld [vmem:[#allocation5 + $0x998] sm:$0xff] }
  0x73   :  { %1213 = vmatpush1.bf16.xpose.msra.mxu0 %v1212_v35  ;;  %v268_v35 = vld [vmem:[#allocation5 + $0x680] sm:$0xff]  ;;  %v1494_v46 = vpack.c.bf16 %v549_v42, %v541_v41  ;;  %v301_v51 = vld [vmem:[#allocation5 + $0x788] sm:$0xff]  ;;  %v375_v40 = vld [vmem:[#allocation5 + $0x9d8] sm:$0xff] }
  0x74   :  { %1215 = vmatprep.subr.bf16.mxu0 %v1214_v37  ;;  %v524_v37 = vld [vmem:[#allocation5 + $0xe80] sm:$0xff]  ;;  %v309_v52 = vld [vmem:[#allocation5 + $0x7c8] sm:$0xff]  ;;  %v423_v12 = vld [vmem:[#allocation5 + $0xb58] sm:$0xff] }
  0x75   :  { %1469 = vmatpush1.bf16.xpose.msra.mxu1 %v1468_v36  ;;  %v276_v36 = vld [vmem:[#allocation5 + $0x6c0] sm:$0xff]  ;;  %v557_v53 = vld [vmem:[#allocation5 + $0xf88] sm:$0xff]  ;;  %v1242_v57 = vpack.c.bf16 %v309_v52, %v301_v51  ;;  %v383_v51 = vld [vmem:[#allocation5 + $0xa18] sm:$0xff] }
  0x76   :  { %1471 = vmatprep.subr.bf16.mxu1 %v1470_v38  ;;  %v532_v38 = vld [vmem:[#allocation5 + $0xec0] sm:$0xff]  ;;  %v1236_v43 = vpack.c.bf16 %v276_v36, %v268_v35  ;;  %v565_v54 = vld [vmem:[#allocation5 + $0xfc8] sm:$0xff]  ;;  %v350_v35 = vld [vmem:[#allocation5 + $0x910] sm:$0xff] }
  0x77   :  { %v1492_v44 = vpack.c.bf16 %v532_v38, %v524_v37  ;;  %v1498_v58 = vpack.c.bf16 %v565_v54, %v557_v53  ;;  %v358_v36 = vld [vmem:[#allocation5 + $0x950] sm:$0xff]  ;;  %v111_v37 = vld [vmem:[#allocation5 + $0x198] sm:$0xff] }
  0x78   :  { %v119_v38 = vld [vmem:[#allocation5 + $0x1d8] sm:$0xff]  ;;  %v1512_v42 = vpack.c.bf16 %v358_v36, %v350_v35 }
  0x79   :  { %v391_v52 = vld [vmem:[#allocation5 + $0xa58] sm:$0xff] }
  0x7a   :  { %v431_v23 = vld [vmem:[#allocation5 + $0xb98] sm:$0xff] }
  0x7b   :  { %1217 = vmatpush1.bf16.xpose.msra.mxu0 %v1216_v47  ;;  %v284_v47 = vld [vmem:[#allocation5 + $0x700] sm:$0xff]  ;;  %v439_v24 = vld [vmem:[#allocation5 + $0xbd8] sm:$0xff] }
  0x7c   :  { %1219 = vmatprep.subr.bf16.mxu0 %v1218_v49  ;;  %v540_v49 = vld [vmem:[#allocation5 + $0xf00] sm:$0xff]  ;;  %v447_v35 = vld [vmem:[#allocation5 + $0xc18] sm:$0xff] }
  0x7d   :  { %1473 = vmatpush1.bf16.xpose.msra.mxu1 %v1472_v48  ;;  %v292_v48 = vld [vmem:[#allocation5 + $0x740] sm:$0xff]  ;;  %v455_v36 = vld [vmem:[#allocation5 + $0xc58] sm:$0xff] }
  0x7e   :  { %1475 = vmatprep.subr.bf16.mxu1 %v1474_v50  ;;  %v548_v50 = vld [vmem:[#allocation5 + $0xf40] sm:$0xff]  ;;  %v1240_v55 = vpack.c.bf16 %v292_v48, %v284_v47  ;;  %v366_v47 = vld [vmem:[#allocation5 + $0x990] sm:$0xff] }
  0x7f   :  { %v1496_v56 = vpack.c.bf16 %v548_v50, %v540_v49  ;;  %v374_v48 = vld [vmem:[#allocation5 + $0x9d0] sm:$0xff]  ;;  %v127_v49 = vld [vmem:[#allocation5 + $0x218] sm:$0xff] }
  0x80   :  { %v135_v50 = vld [vmem:[#allocation5 + $0x258] sm:$0xff]  ;;  %v1516_v54 = vpack.c.bf16 %v374_v48, %v366_v47 }
  0x81   :  { %v463_v47 = vld [vmem:[#allocation5 + $0xc98] sm:$0xff] }
  0x82   :  { %v471_v48 = vld [vmem:[#allocation5 + $0xcd8] sm:$0xff] }
  0x83   :  { %1221 = vmatpush1.bf16.xpose.msra.mxu0 %v1220_v59  ;;  %v300_v59 = vld [vmem:[#allocation5 + $0x780] sm:$0xff] }
  0x84   :  { %1223 = vmatprep.subr.bf16.mxu0 %v1222_v61  ;;  %v556_v61 = vld [vmem:[#allocation5 + $0xf80] sm:$0xff] }
  0x85   :  { %1477 = vmatpush1.bf16.xpose.msra.mxu1 %v1476_v60  ;;  %v308_v60 = vld [vmem:[#allocation5 + $0x7c0] sm:$0xff] }
  0x86   :  { %1479 = vmatprep.subr.bf16.mxu1 %v1478_v62  ;;  %v564_v62 = vld [vmem:[#allocation5 + $0xfc0] sm:$0xff]  ;;  %v1244_v3 = vpack.c.bf16 %v308_v60, %v300_v59  ;;  %v382_v59 = vld [vmem:[#allocation5 + $0xa10] sm:$0xff] }
  0x87   :  { %v1500_v4 = vpack.c.bf16 %v564_v62, %v556_v61  ;;  %v390_v60 = vld [vmem:[#allocation5 + $0xa50] sm:$0xff]  ;;  %v143_v61 = vld [vmem:[#allocation5 + $0x298] sm:$0xff] }
  0x88   :  { %v151_v62 = vld [vmem:[#allocation5 + $0x2d8] sm:$0xff]  ;;  %v1520_v2 = vpack.c.bf16 %v390_v60, %v382_v59 }
  0x89   :  { %v479_v59 = vld [vmem:[#allocation5 + $0xd18] sm:$0xff] }
  0x8a   :  { %v487_v60 = vld [vmem:[#allocation5 + $0xd58] sm:$0xff] }
  0x8b   :  { %1225 = vmatpush1.bf16.xpose.msra.mxu0 %v1224_v7  ;;  %v62_v7 = vld [vmem:[#allocation5 + $0x10] sm:$0xff] }
  0x8c   :  { %1227 = vmatprep.subr.bf16.mxu0 %v1226_v9  ;;  %v318_v9 = vld [vmem:[#allocation5 + $0x810] sm:$0xff] }
  0x8d   :  { %1481 = vmatpush1.bf16.xpose.msra.mxu1 %v1480_v8  ;;  %v70_v8 = vld [vmem:[#allocation5 + $0x50] sm:$0xff] }
  0x8e   :  { %1483 = vmatprep.subr.bf16.mxu1 %v1482_v10  ;;  %v326_v10 = vld [vmem:[#allocation5 + $0x850] sm:$0xff]  ;;  %v1248_v16 = vpack.c.bf16 %v70_v8, %v62_v7 }
  0x8f   :  { %v1504_v17 = vpack.c.bf16 %v326_v10, %v318_v9  ;;  %v398_v7 = vld [vmem:[#allocation5 + $0xa90] sm:$0xff]  ;;  %v159_v9 = vld [vmem:[#allocation5 + $0x318] sm:$0xff] }
  0x90   :  { %v406_v8 = vld [vmem:[#allocation5 + $0xad0] sm:$0xff]  ;;  %v167_v10 = vld [vmem:[#allocation5 + $0x358] sm:$0xff] }
  0x93   :  { %1229 = vmatpush1.bf16.xpose.msra.mxu0 %v1228_v19  ;;  %v1506_v19 = vpack.c.bf16 %v343_v14, %v335_v13  ;;  %v1524_v14 = vpack.c.bf16 %v406_v8, %v398_v7  ;;  %v495_v7 = vld [vmem:[#allocation5 + $0xd98] sm:$0xff] }
  0x94   :  { %1231 = vmatprep.subr.bf16.mxu0 %v1230_v21  ;;  %v78_v21 = vld [vmem:[#allocation5 + $0x90] sm:$0xff]  ;;  %v503_v8 = vld [vmem:[#allocation5 + $0xdd8] sm:$0xff] }
  0x95   :  { %1485 = vmatpush1.bf16.xpose.msra.mxu1 %v1484_v20  ;;  %v55_v20 = vld [vmem:[#allocation2 + $0x18] sm:$0xff] }
  0x96   :  { %1487 = vmatprep.subr.bf16.mxu1 %v1486_v22  ;;  %v86_v22 = vld [vmem:[#allocation5 + $0xd0] sm:$0xff] }
  0x97   :  { %v1252_v29 = vpack.c.bf16 %v86_v22, %v78_v21  ;;  %v175_v21 = vld [vmem:[#allocation5 + $0x398] sm:$0xff] }
  0x98   :  { %v183_v22 = vld [vmem:[#allocation5 + $0x3d8] sm:$0xff] }
  0x9b   :  { %1233 = vmatpush1.bf16.xpose.msra.mxu0 %v1232_v31  ;;  %v1254_v31 = vpack.c.bf16 %v103_v26, %v95_v25 }
  0x9c   :  { %1235 = vmatprep.subr.bf16.mxu0 %v1234_v33  ;;  %v94_v33 = vld [vmem:[#allocation5 + $0x110] sm:$0xff] }
  0x9d   :  { %1489 = vmatpush1.bf16.xpose.msra.mxu1 %v1488_v32  ;;  %v1510_v32 = vpack.c.bf16 %v359_v28, %v351_v27  ;;  %v1274_v27 = vpack.c.bf16 %v183_v22, %v175_v21  ;;  %v1530_v28 = vpack.c.bf16 %v439_v24, %v431_v23 }
  0x9e   :  { %1491 = vmatprep.subr.bf16.mxu1 %v1490_v34  ;;  %v102_v34 = vld [vmem:[#allocation5 + $0x150] sm:$0xff] }
  0x9f   :  { %v1256_v41 = vpack.c.bf16 %v102_v34, %v94_v33  ;;  %v191_v33 = vld [vmem:[#allocation5 + $0x418] sm:$0xff] }
  0xa0   :  { %v199_v34 = vld [vmem:[#allocation5 + $0x458] sm:$0xff] }
  0xa3   :  { %1237 = vmatpush1.bf16.xpose.msra.mxu0 %v1236_v43  ;;  %v1258_v43 = vpack.c.bf16 %v119_v38, %v111_v37 }
  0xa4   :  { %1239 = vmatprep.subr.bf16.mxu0 %v1238_v45  ;;  %v110_v45 = vld [vmem:[#allocation5 + $0x190] sm:$0xff] }
  0xa5   :  { %1493 = vmatpush1.bf16.xpose.msra.mxu1 %v1492_v44  ;;  %v1514_v44 = vpack.c.bf16 %v375_v40, %v367_v39  ;;  %v1278_v39 = vpack.c.bf16 %v199_v34, %v191_v33  ;;  %v1534_v40 = vpack.c.bf16 %v455_v36, %v447_v35 }
  0xa6   :  { %1495 = vmatprep.subr.bf16.mxu1 %v1494_v46  ;;  %v118_v46 = vld [vmem:[#allocation5 + $0x1d0] sm:$0xff] }
  0xa7   :  { %v1260_v53 = vpack.c.bf16 %v118_v46, %v110_v45  ;;  %v207_v45 = vld [vmem:[#allocation5 + $0x498] sm:$0xff] }
  0xa8   :  { %v215_v46 = vld [vmem:[#allocation5 + $0x4d8] sm:$0xff] }
  0xab   :  { %1241 = vmatpush1.bf16.xpose.msra.mxu0 %v1240_v55  ;;  %v1262_v55 = vpack.c.bf16 %v135_v50, %v127_v49 }
  0xac   :  { %1243 = vmatprep.subr.bf16.mxu0 %v1242_v57  ;;  %v126_v57 = vld [vmem:[#allocation5 + $0x210] sm:$0xff] }
  0xad   :  { %1497 = vmatpush1.bf16.xpose.msra.mxu1 %v1496_v56  ;;  %v1518_v56 = vpack.c.bf16 %v391_v52, %v383_v51  ;;  %v1282_v51 = vpack.c.bf16 %v215_v46, %v207_v45  ;;  %v1538_v52 = vpack.c.bf16 %v471_v48, %v463_v47 }
  0xae   :  { %1499 = vmatprep.subr.bf16.mxu1 %v1498_v58  ;;  %v134_v58 = vld [vmem:[#allocation5 + $0x250] sm:$0xff] }
  0xaf   :  { %v1264_v1 = vpack.c.bf16 %v134_v58, %v126_v57  ;;  %v223_v57 = vld [vmem:[#allocation5 + $0x518] sm:$0xff] }
  0xb0   :  { %v231_v58 = vld [vmem:[#allocation5 + $0x558] sm:$0xff] }
  0xb3   :  { %1245 = vmatpush1.bf16.xpose.msra.mxu0 %v1244_v3  ;;  %v1266_v3 = vpack.c.bf16 %v151_v62, %v143_v61 }
  0xb4   :  { %1247 = vmatprep.subr.bf16.mxu0 %v1246_v5  ;;  %v142_v5 = vld [vmem:[#allocation5 + $0x290] sm:$0xff] }
  0xb5   :  { %1501 = vmatpush1.bf16.xpose.msra.mxu1 %v1500_v4  ;;  %v1522_v4 = vpack.c.bf16 %v407_v0, %v399_v63  ;;  %v1286_v63 = vpack.c.bf16 %v231_v58, %v223_v57  ;;  %v1542_v0 = vpack.c.bf16 %v487_v60, %v479_v59 }
  0xb6   :  { %1503 = vmatprep.subr.bf16.mxu1 %v1502_v6  ;;  %v150_v6 = vld [vmem:[#allocation5 + $0x2d0] sm:$0xff] }
  0xb7   :  { %v1268_v13 = vpack.c.bf16 %v150_v6, %v142_v5  ;;  %v239_v5 = vld [vmem:[#allocation5 + $0x598] sm:$0xff] }
  0xb8   :  { %v247_v6 = vld [vmem:[#allocation5 + $0x5d8] sm:$0xff] }
  0xba   :  { %659 = vmatmul.mubr.f32.vlgmr.msra.gmra.mrb[0].mxu0 %v52_v15 }
  0xbb   :  { %1249 = vmatpush1.bf16.xpose.msra.mxu0 %v1248_v16  ;;  %729 = vmatprep.mubr.f32.mxu0 %v55_v20  ;;  %v1526_v16 = vpack.c.bf16 %v423_v12, %v415_v11  ;;  %v1290_v11 = vpack.c.bf16 %v247_v6, %v239_v5  ;;  %v1546_v12 = vpack.c.bf16 %v503_v8, %v495_v7 }
  0xbc   :  { %943 = vmatmul.mubr.f32.vlgmr.msra.gmra.mrb[0].mxu1 %v52_v15  ;;  %1251 = vmatprep.subr.bf16.mxu0 %v1250_v18  ;;  %v1270_v15 = vpack.c.bf16 %v167_v10, %v159_v9  ;;  %v166_v18 = vld [vmem:[#allocation5 + $0x350] sm:$0xff] }
  0xbd   :  { %1505 = vmatpush1.bf16.xpose.msra.mxu1 %v1504_v17  ;;  %1013 = vmatprep.mubr.f32.mxu1 %v55_v20  ;;  %v158_v17 = vld [vmem:[#allocation5 + $0x310] sm:$0xff] }
  0xbe   :  { %1507 = vmatprep.subr.bf16.mxu1 %v1506_v19  ;;  %v414_v19 = vld [vmem:[#allocation5 + $0xb10] sm:$0xff]  ;;  %v1272_v25 = vpack.c.bf16 %v166_v18, %v158_v17  ;;  %v255_v17 = vld [vmem:[#allocation5 + $0x618] sm:$0xff] }
  0xbf   :  { %v422_v20 = vld [vmem:[#allocation5 + $0xb50] sm:$0xff]  ;;  %v263_v18 = vld [vmem:[#allocation5 + $0x658] sm:$0xff] }
  0xc0   :  { %v1528_v26 = vpack.c.bf16 %v422_v20, %v414_v19  ;;  %v511_v19 = vld [vmem:[#allocation5 + $0xe18] sm:$0xff]  ;;  %v1294_v23 = vpack.c.bf16 %v263_v18, %v255_v17  ;;  %v54_v17 = vld [vmem:[#allocation2 + $0x10] sm:$0xff] }
  0xc1   :  { %v519_v20 = vld [vmem:[#allocation5 + $0xe58] sm:$0xff] }
  0xc2   :  { %v1550_v24 = vpack.c.bf16 %v519_v20, %v511_v19 }
  0xc3   :  { %1253 = vmatpush1.bf16.xpose.msra.mxu0 %v1252_v29  ;;  %v174_v29 = vld [vmem:[#allocation5 + $0x390] sm:$0xff] }
  0xc4   :  { %1255 = vmatprep.subr.bf16.mxu0 %v1254_v31  ;;  %v430_v31 = vld [vmem:[#allocation5 + $0xb90] sm:$0xff] }
  0xc5   :  { %1509 = vmatpush1.bf16.xpose.msra.mxu1 %v1508_v30  ;;  %v182_v30 = vld [vmem:[#allocation5 + $0x3d0] sm:$0xff] }
  0xc6   :  { %1511 = vmatprep.subr.bf16.mxu1 %v1510_v32  ;;  %v438_v32 = vld [vmem:[#allocation5 + $0xbd0] sm:$0xff]  ;;  %v1276_v37 = vpack.c.bf16 %v182_v30, %v174_v29  ;;  %v271_v29 = vld [vmem:[#allocation5 + $0x698] sm:$0xff] }
  0xc7   :  { %v1532_v38 = vpack.c.bf16 %v438_v32, %v430_v31  ;;  %v279_v30 = vld [vmem:[#allocation5 + $0x6d8] sm:$0xff] }
  0xc8   :  { %v527_v31 = vld [vmem:[#allocation5 + $0xe98] sm:$0xff]  ;;  %v1298_v35 = vpack.c.bf16 %v279_v30, %v271_v29  ;;  %v353_v29 = vld [vmem:[#allocation5 + $0x928] sm:$0xff] }
  0xc9   :  { %v535_v32 = vld [vmem:[#allocation5 + $0xed8] sm:$0xff]  ;;  %v361_v30 = vld [vmem:[#allocation5 + $0x968] sm:$0xff] }
  0xca   :  { %v1554_v36 = vpack.c.bf16 %v535_v32, %v527_v31 }
  0xcb   :  { %1257 = vmatpush1.bf16.xpose.msra.mxu0 %v1256_v41  ;;  %v190_v41 = vld [vmem:[#allocation5 + $0x410] sm:$0xff] }
  0xcc   :  { %1259 = vmatprep.subr.bf16.mxu0 %v1258_v43  ;;  %v446_v43 = vld [vmem:[#allocation5 + $0xc10] sm:$0xff] }
  0xcd   :  { %1513 = vmatpush1.bf16.xpose.msra.mxu1 %v1512_v42  ;;  %v198_v42 = vld [vmem:[#allocation5 + $0x450] sm:$0xff] }
  0xce   :  { %1515 = vmatprep.subr.bf16.mxu1 %v1514_v44  ;;  %v454_v44 = vld [vmem:[#allocation5 + $0xc50] sm:$0xff]  ;;  %v1280_v49 = vpack.c.bf16 %v198_v42, %v190_v41  ;;  %v287_v41 = vld [vmem:[#allocation5 + $0x718] sm:$0xff] }
  0xcf   :  { %v1536_v50 = vpack.c.bf16 %v454_v44, %v446_v43  ;;  %v295_v42 = vld [vmem:[#allocation5 + $0x758] sm:$0xff] }
  0xd0   :  { %v543_v43 = vld [vmem:[#allocation5 + $0xf18] sm:$0xff]  ;;  %v1302_v47 = vpack.c.bf16 %v295_v42, %v287_v41  ;;  %v369_v41 = vld [vmem:[#allocation5 + $0x9a8] sm:$0xff] }
  0xd1   :  { %v551_v44 = vld [vmem:[#allocation5 + $0xf58] sm:$0xff]  ;;  %v377_v42 = vld [vmem:[#allocation5 + $0x9e8] sm:$0xff] }
  0xd2   :  { %v1558_v48 = vpack.c.bf16 %v551_v44, %v543_v43 }
  0xd3   :  { %1261 = vmatpush1.bf16.xpose.msra.mxu0 %v1260_v53  ;;  %v206_v53 = vld [vmem:[#allocation5 + $0x490] sm:$0xff] }
  0xd4   :  { %1263 = vmatprep.subr.bf16.mxu0 %v1262_v55  ;;  %v462_v55 = vld [vmem:[#allocation5 + $0xc90] sm:$0xff] }
  0xd5   :  { %1517 = vmatpush1.bf16.xpose.msra.mxu1 %v1516_v54  ;;  %v214_v54 = vld [vmem:[#allocation5 + $0x4d0] sm:$0xff] }
  0xd6   :  { %1519 = vmatprep.subr.bf16.mxu1 %v1518_v56  ;;  %v470_v56 = vld [vmem:[#allocation5 + $0xcd0] sm:$0xff]  ;;  %v1284_v61 = vpack.c.bf16 %v214_v54, %v206_v53  ;;  %v303_v53 = vld [vmem:[#allocation5 + $0x798] sm:$0xff] }
  0xd7   :  { %v1540_v62 = vpack.c.bf16 %v470_v56, %v462_v55  ;;  %v311_v54 = vld [vmem:[#allocation5 + $0x7d8] sm:$0xff] }
  0xd8   :  { %v559_v55 = vld [vmem:[#allocation5 + $0xf98] sm:$0xff]  ;;  %v1306_v59 = vpack.c.bf16 %v311_v54, %v303_v53  ;;  %v385_v53 = vld [vmem:[#allocation5 + $0xa28] sm:$0xff] }
  0xd9   :  { %v567_v56 = vld [vmem:[#allocation5 + $0xfd8] sm:$0xff]  ;;  %v393_v54 = vld [vmem:[#allocation5 + $0xa68] sm:$0xff] }
  0xda   :  { %v1562_v60 = vpack.c.bf16 %v567_v56, %v559_v55 }
  0xdb   :  { %1265 = vmatpush1.bf16.xpose.msra.mxu0 %v1264_v1  ;;  %v222_v1 = vld [vmem:[#allocation5 + $0x510] sm:$0xff] }
  0xdc   :  { %1267 = vmatprep.subr.bf16.mxu0 %v1266_v3  ;;  %v478_v3 = vld [vmem:[#allocation5 + $0xd10] sm:$0xff] }
  0xdd   :  { %1521 = vmatpush1.bf16.xpose.msra.mxu1 %v1520_v2  ;;  %v230_v2 = vld [vmem:[#allocation5 + $0x550] sm:$0xff] }
  0xde   :  { %1523 = vmatprep.subr.bf16.mxu1 %v1522_v4  ;;  %v486_v4 = vld [vmem:[#allocation5 + $0xd50] sm:$0xff]  ;;  %v1288_v9 = vpack.c.bf16 %v230_v2, %v222_v1  ;;  %v65_v1 = vld [vmem:[#allocation5 + $0x28] sm:$0xff] }
  0xdf   :  { %v1544_v10 = vpack.c.bf16 %v486_v4, %v478_v3  ;;  %v73_v2 = vld [vmem:[#allocation5 + $0x68] sm:$0xff] }
  0xe0   :  { %v321_v3 = vld [vmem:[#allocation5 + $0x828] sm:$0xff]  ;;  %v1310_v7 = vpack.c.bf16 %v73_v2, %v65_v1 }
  0xe1   :  { %v329_v4 = vld [vmem:[#allocation5 + $0x868] sm:$0xff] }
  0xe2   :  { %v1566_v8 = vpack.c.bf16 %v329_v4, %v321_v3  ;;  %v401_v1 = vld [vmem:[#allocation5 + $0xaa8] sm:$0xff] }
  0xe3   :  { %1269 = vmatpush1.bf16.xpose.msra.mxu0 %v1268_v13  ;;  %v238_v13 = vld [vmem:[#allocation5 + $0x590] sm:$0xff]  ;;  %v409_v2 = vld [vmem:[#allocation5 + $0xae8] sm:$0xff] }
  0xe4   :  { %1271 = vmatprep.subr.bf16.mxu0 %v1270_v15  ;;  %v494_v15 = vld [vmem:[#allocation5 + $0xd90] sm:$0xff] }
  0xe5   :  { %1525 = vmatpush1.bf16.xpose.msra.mxu1 %v1524_v14  ;;  %v246_v14 = vld [vmem:[#allocation5 + $0x5d0] sm:$0xff] }
  0xe6   :  { %1527 = vmatprep.subr.bf16.mxu1 %v1526_v16  ;;  %v502_v16 = vld [vmem:[#allocation5 + $0xdd0] sm:$0xff]  ;;  %v1292_v21 = vpack.c.bf16 %v246_v14, %v238_v13  ;;  %v81_v13 = vld [vmem:[#allocation5 + $0xa8] sm:$0xff] }
  0xe7   :  { %v1548_v22 = vpack.c.bf16 %v502_v16, %v494_v15  ;;  %v89_v14 = vld [vmem:[#allocation5 + $0xe8] sm:$0xff] }
  0xe8   :  { %v337_v15 = vld [vmem:[#allocation5 + $0x8a8] sm:$0xff]  ;;  %v1314_v20 = vpack.c.bf16 %v89_v14, %v81_v13 }
  0xe9   :  { %v345_v16 = vld [vmem:[#allocation5 + $0x8e8] sm:$0xff] }
  0xea   :  { %v417_v13 = vld [vmem:[#allocation5 + $0xb28] sm:$0xff] }
  0xeb   :  { %1273 = vmatpush1.bf16.xpose.msra.mxu0 %v1272_v25  ;;  %v254_v25 = vld [vmem:[#allocation5 + $0x610] sm:$0xff]  ;;  %v425_v14 = vld [vmem:[#allocation5 + $0xb68] sm:$0xff] }
  0xec   :  { %1275 = vmatprep.subr.bf16.mxu0 %v1274_v27  ;;  %v510_v27 = vld [vmem:[#allocation5 + $0xe10] sm:$0xff] }
  0xed   :  { %1529 = vmatpush1.bf16.xpose.msra.mxu1 %v1528_v26  ;;  %v262_v26 = vld [vmem:[#allocation5 + $0x650] sm:$0xff] }
  0xee   :  { %1531 = vmatprep.subr.bf16.mxu1 %v1530_v28  ;;  %v518_v28 = vld [vmem:[#allocation5 + $0xe50] sm:$0xff]  ;;  %v1296_v33 = vpack.c.bf16 %v262_v26, %v254_v25  ;;  %v336_v25 = vld [vmem:[#allocation5 + $0x8a0] sm:$0xff] }
  0xef   :  { %v1552_v34 = vpack.c.bf16 %v518_v28, %v510_v27  ;;  %v344_v26 = vld [vmem:[#allocation5 + $0x8e0] sm:$0xff]  ;;  %v97_v27 = vld [vmem:[#allocation5 + $0x128] sm:$0xff] }
  0xf0   :  { %v105_v28 = vld [vmem:[#allocation5 + $0x168] sm:$0xff]  ;;  %v1572_v32 = vpack.c.bf16 %v344_v26, %v336_v25 }
  0xf1   :  { %v433_v25 = vld [vmem:[#allocation5 + $0xba8] sm:$0xff] }
  0xf2   :  { %v441_v26 = vld [vmem:[#allocation5 + $0xbe8] sm:$0xff] }
  0xf3   :  { %1277 = vmatpush1.bf16.xpose.msra.mxu0 %v1276_v37  ;;  %v270_v37 = vld [vmem:[#allocation5 + $0x690] sm:$0xff] }
  0xf4   :  { %1279 = vmatprep.subr.bf16.mxu0 %v1278_v39  ;;  %v526_v39 = vld [vmem:[#allocation5 + $0xe90] sm:$0xff] }
  0xf5   :  { %1533 = vmatpush1.bf16.xpose.msra.mxu1 %v1532_v38  ;;  %v278_v38 = vld [vmem:[#allocation5 + $0x6d0] sm:$0xff] }
  0xf6   :  { %1535 = vmatprep.subr.bf16.mxu1 %v1534_v40  ;;  %v534_v40 = vld [vmem:[#allocation5 + $0xed0] sm:$0xff]  ;;  %v1300_v45 = vpack.c.bf16 %v278_v38, %v270_v37  ;;  %v352_v37 = vld [vmem:[#allocation5 + $0x920] sm:$0xff] }
  0xf7   :  { %v1556_v46 = vpack.c.bf16 %v534_v40, %v526_v39  ;;  %v360_v38 = vld [vmem:[#allocation5 + $0x960] sm:$0xff]  ;;  %v113_v39 = vld [vmem:[#allocation5 + $0x1a8] sm:$0xff] }
  0xf8   :  { %v121_v40 = vld [vmem:[#allocation5 + $0x1e8] sm:$0xff]  ;;  %v1576_v44 = vpack.c.bf16 %v360_v38, %v352_v37 }
  0xf9   :  { %v449_v37 = vld [vmem:[#allocation5 + $0xc28] sm:$0xff] }
  0xfa   :  { %v457_v38 = vld [vmem:[#allocation5 + $0xc68] sm:$0xff] }
  0xfb   :  { %1281 = vmatpush1.bf16.xpose.msra.mxu0 %v1280_v49  ;;  %v286_v49 = vld [vmem:[#allocation5 + $0x710] sm:$0xff] }
  0xfc   :  { %1283 = vmatprep.subr.bf16.mxu0 %v1282_v51  ;;  %v542_v51 = vld [vmem:[#allocation5 + $0xf10] sm:$0xff] }
  0xfd   :  { %1537 = vmatpush1.bf16.xpose.msra.mxu1 %v1536_v50  ;;  %v294_v50 = vld [vmem:[#allocation5 + $0x750] sm:$0xff] }
  0xfe   :  { %1539 = vmatprep.subr.bf16.mxu1 %v1538_v52  ;;  %v550_v52 = vld [vmem:[#allocation5 + $0xf50] sm:$0xff]  ;;  %v1304_v57 = vpack.c.bf16 %v294_v50, %v286_v49  ;;  %v368_v49 = vld [vmem:[#allocation5 + $0x9a0] sm:$0xff] }
  0xff   :  { %v1560_v58 = vpack.c.bf16 %v550_v52, %v542_v51  ;;  %v376_v50 = vld [vmem:[#allocation5 + $0x9e0] sm:$0xff]  ;;  %v129_v51 = vld [vmem:[#allocation5 + $0x228] sm:$0xff] }
 0x100   :  { %v137_v52 = vld [vmem:[#allocation5 + $0x268] sm:$0xff]  ;;  %v1580_v56 = vpack.c.bf16 %v376_v50, %v368_v49 }
 0x101   :  { %v465_v49 = vld [vmem:[#allocation5 + $0xca8] sm:$0xff] }
 0x102   :  { %v473_v50 = vld [vmem:[#allocation5 + $0xce8] sm:$0xff] }
 0x103   :  { %1285 = vmatpush1.bf16.xpose.msra.mxu0 %v1284_v61  ;;  %v302_v61 = vld [vmem:[#allocation5 + $0x790] sm:$0xff] }
 0x104   :  { %1287 = vmatprep.subr.bf16.mxu0 %v1286_v63  ;;  %v558_v63 = vld [vmem:[#allocation5 + $0xf90] sm:$0xff] }
 0x105   :  { %1541 = vmatpush1.bf16.xpose.msra.mxu1 %v1540_v62  ;;  %v310_v62 = vld [vmem:[#allocation5 + $0x7d0] sm:$0xff] }
 0x106   :  { %1543 = vmatprep.subr.bf16.mxu1 %v1542_v0  ;;  %v566_v0 = vld [vmem:[#allocation5 + $0xfd0] sm:$0xff]  ;;  %v1308_v5 = vpack.c.bf16 %v310_v62, %v302_v61  ;;  %v384_v61 = vld [vmem:[#allocation5 + $0xa20] sm:$0xff] }
 0x107   :  { %v1564_v6 = vpack.c.bf16 %v566_v0, %v558_v63  ;;  %v392_v62 = vld [vmem:[#allocation5 + $0xa60] sm:$0xff]  ;;  %v145_v63 = vld [vmem:[#allocation5 + $0x2a8] sm:$0xff] }
 0x108   :  { %v153_v0 = vld [vmem:[#allocation5 + $0x2e8] sm:$0xff]  ;;  %v1584_v4 = vpack.c.bf16 %v392_v62, %v384_v61 }
 0x109   :  { %v481_v61 = vld [vmem:[#allocation5 + $0xd28] sm:$0xff] }
 0x10a   :  { %v489_v62 = vld [vmem:[#allocation5 + $0xd68] sm:$0xff] }
 0x10b   :  { %1289 = vmatpush1.bf16.xpose.msra.mxu0 %v1288_v9  ;;  %v64_v9 = vld [vmem:[#allocation5 + $0x20] sm:$0xff] }
 0x10c   :  { %1291 = vmatprep.subr.bf16.mxu0 %v1290_v11  ;;  %v320_v11 = vld [vmem:[#allocation5 + $0x820] sm:$0xff] }
 0x10d   :  { %1545 = vmatpush1.bf16.xpose.msra.mxu1 %v1544_v10  ;;  %v72_v10 = vld [vmem:[#allocation5 + $0x60] sm:$0xff] }
 0x10e   :  { %1547 = vmatprep.subr.bf16.mxu1 %v1546_v12  ;;  %v328_v12 = vld [vmem:[#allocation5 + $0x860] sm:$0xff]  ;;  %v1312_v18 = vpack.c.bf16 %v72_v10, %v64_v9 }
 0x10f   :  { %v1568_v19 = vpack.c.bf16 %v328_v12, %v320_v11  ;;  %v400_v9 = vld [vmem:[#allocation5 + $0xaa0] sm:$0xff]  ;;  %v161_v11 = vld [vmem:[#allocation5 + $0x328] sm:$0xff] }
 0x110   :  { %v408_v10 = vld [vmem:[#allocation5 + $0xae0] sm:$0xff]  ;;  %v169_v12 = vld [vmem:[#allocation5 + $0x368] sm:$0xff] }
 0x113   :  { %1293 = vmatpush1.bf16.xpose.msra.mxu0 %v1292_v21  ;;  %v1570_v21 = vpack.c.bf16 %v345_v16, %v337_v15  ;;  %v1588_v16 = vpack.c.bf16 %v408_v10, %v400_v9  ;;  %v497_v9 = vld [vmem:[#allocation5 + $0xda8] sm:$0xff] }
 0x114   :  { %1295 = vmatprep.subr.bf16.mxu0 %v1294_v23  ;;  %v80_v23 = vld [vmem:[#allocation5 + $0xa0] sm:$0xff]  ;;  %v505_v10 = vld [vmem:[#allocation5 + $0xde8] sm:$0xff] }
 0x115   :  { %1549 = vmatpush1.bf16.xpose.msra.mxu1 %v1548_v22  ;;  %v57_v22 = vld [vmem:[#allocation2 + $0x28] sm:$0xff] }
 0x116   :  { %1551 = vmatprep.subr.bf16.mxu1 %v1550_v24  ;;  %v88_v24 = vld [vmem:[#allocation5 + $0xe0] sm:$0xff] }
 0x117   :  { %v1316_v31 = vpack.c.bf16 %v88_v24, %v80_v23  ;;  %v177_v23 = vld [vmem:[#allocation5 + $0x3a8] sm:$0xff] }
 0x118   :  { %v185_v24 = vld [vmem:[#allocation5 + $0x3e8] sm:$0xff] }
 0x11b   :  { %1297 = vmatpush1.bf16.xpose.msra.mxu0 %v1296_v33  ;;  %v1318_v33 = vpack.c.bf16 %v105_v28, %v97_v27 }
 0x11c   :  { %1299 = vmatprep.subr.bf16.mxu0 %v1298_v35  ;;  %v96_v35 = vld [vmem:[#allocation5 + $0x120] sm:$0xff] }
 0x11d   :  { %1553 = vmatpush1.bf16.xpose.msra.mxu1 %v1552_v34  ;;  %v1574_v34 = vpack.c.bf16 %v361_v30, %v353_v29  ;;  %v1338_v29 = vpack.c.bf16 %v185_v24, %v177_v23  ;;  %v1594_v30 = vpack.c.bf16 %v441_v26, %v433_v25 }
 0x11e   :  { %1555 = vmatprep.subr.bf16.mxu1 %v1554_v36  ;;  %v104_v36 = vld [vmem:[#allocation5 + $0x160] sm:$0xff] }
 0x11f   :  { %v1320_v43 = vpack.c.bf16 %v104_v36, %v96_v35  ;;  %v193_v35 = vld [vmem:[#allocation5 + $0x428] sm:$0xff] }
 0x120   :  { %v201_v36 = vld [vmem:[#allocation5 + $0x468] sm:$0xff] }
 0x123   :  { %1301 = vmatpush1.bf16.xpose.msra.mxu0 %v1300_v45  ;;  %v1322_v45 = vpack.c.bf16 %v121_v40, %v113_v39 }
 0x124   :  { %1303 = vmatprep.subr.bf16.mxu0 %v1302_v47  ;;  %v112_v47 = vld [vmem:[#allocation5 + $0x1a0] sm:$0xff] }
 0x125   :  { %1557 = vmatpush1.bf16.xpose.msra.mxu1 %v1556_v46  ;;  %v1578_v46 = vpack.c.bf16 %v377_v42, %v369_v41  ;;  %v1342_v41 = vpack.c.bf16 %v201_v36, %v193_v35  ;;  %v1598_v42 = vpack.c.bf16 %v457_v38, %v449_v37 }
 0x126   :  { %1559 = vmatprep.subr.bf16.mxu1 %v1558_v48  ;;  %v120_v48 = vld [vmem:[#allocation5 + $0x1e0] sm:$0xff] }
 0x127   :  { %v1324_v55 = vpack.c.bf16 %v120_v48, %v112_v47  ;;  %v209_v47 = vld [vmem:[#allocation5 + $0x4a8] sm:$0xff] }
 0x128   :  { %v217_v48 = vld [vmem:[#allocation5 + $0x4e8] sm:$0xff] }
 0x12b   :  { %1305 = vmatpush1.bf16.xpose.msra.mxu0 %v1304_v57  ;;  %v1326_v57 = vpack.c.bf16 %v137_v52, %v129_v51 }
 0x12c   :  { %1307 = vmatprep.subr.bf16.mxu0 %v1306_v59  ;;  %v128_v59 = vld [vmem:[#allocation5 + $0x220] sm:$0xff] }
 0x12d   :  { %1561 = vmatpush1.bf16.xpose.msra.mxu1 %v1560_v58  ;;  %v1582_v58 = vpack.c.bf16 %v393_v54, %v385_v53  ;;  %v1346_v53 = vpack.c.bf16 %v217_v48, %v209_v47  ;;  %v1602_v54 = vpack.c.bf16 %v473_v50, %v465_v49 }
 0x12e   :  { %1563 = vmatprep.subr.bf16.mxu1 %v1562_v60  ;;  %v136_v60 = vld [vmem:[#allocation5 + $0x260] sm:$0xff] }
 0x12f   :  { %v1328_v3 = vpack.c.bf16 %v136_v60, %v128_v59  ;;  %v225_v59 = vld [vmem:[#allocation5 + $0x528] sm:$0xff] }
 0x130   :  { %v233_v60 = vld [vmem:[#allocation5 + $0x568] sm:$0xff] }
 0x133   :  { %1309 = vmatpush1.bf16.xpose.msra.mxu0 %v1308_v5  ;;  %v1330_v5 = vpack.c.bf16 %v153_v0, %v145_v63 }
 0x134   :  { %1311 = vmatprep.subr.bf16.mxu0 %v1310_v7  ;;  %v144_v7 = vld [vmem:[#allocation5 + $0x2a0] sm:$0xff] }
 0x135   :  { %1565 = vmatpush1.bf16.xpose.msra.mxu1 %v1564_v6  ;;  %v1586_v6 = vpack.c.bf16 %v409_v2, %v401_v1  ;;  %v1350_v1 = vpack.c.bf16 %v233_v60, %v225_v59  ;;  %v1606_v2 = vpack.c.bf16 %v489_v62, %v481_v61 }
 0x136   :  { %1567 = vmatprep.subr.bf16.mxu1 %v1566_v8  ;;  %v152_v8 = vld [vmem:[#allocation5 + $0x2e0] sm:$0xff] }
 0x137   :  { %v1332_v15 = vpack.c.bf16 %v152_v8, %v144_v7  ;;  %v241_v7 = vld [vmem:[#allocation5 + $0x5a8] sm:$0xff] }
 0x138   :  { %v249_v8 = vld [vmem:[#allocation5 + $0x5e8] sm:$0xff] }
 0x13a   :  { %730 = vmatmul.mubr.f32.vlgmr.msra.gmra.mrb[0].mxu0 %v54_v17 }
 0x13b   :  { %1313 = vmatpush1.bf16.xpose.msra.mxu0 %v1312_v18  ;;  %800 = vmatprep.mubr.f32.mxu0 %v57_v22  ;;  %v1590_v18 = vpack.c.bf16 %v425_v14, %v417_v13  ;;  %v1354_v13 = vpack.c.bf16 %v249_v8, %v241_v7  ;;  %v1610_v14 = vpack.c.bf16 %v505_v10, %v497_v9 }
 0x13c   :  { %1014 = vmatmul.mubr.f32.vlgmr.msra.gmra.mrb[0].mxu1 %v54_v17  ;;  %1315 = vmatprep.subr.bf16.mxu0 %v1314_v20  ;;  %v1334_v17 = vpack.c.bf16 %v169_v12, %v161_v11  ;;  %v168_v20 = vld [vmem:[#allocation5 + $0x360] sm:$0xff] }
 0x13d   :  { %1569 = vmatpush1.bf16.xpose.msra.mxu1 %v1568_v19  ;;  %1084 = vmatprep.mubr.f32.mxu1 %v57_v22  ;;  %v160_v19 = vld [vmem:[#allocation5 + $0x320] sm:$0xff] }
 0x13e   :  { %1571 = vmatprep.subr.bf16.mxu1 %v1570_v21  ;;  %v416_v21 = vld [vmem:[#allocation5 + $0xb20] sm:$0xff]  ;;  %v1336_v27 = vpack.c.bf16 %v168_v20, %v160_v19  ;;  %v257_v19 = vld [vmem:[#allocation5 + $0x628] sm:$0xff] }
 0x13f   :  { %v424_v22 = vld [vmem:[#allocation5 + $0xb60] sm:$0xff]  ;;  %v265_v20 = vld [vmem:[#allocation5 + $0x668] sm:$0xff] }
 0x140   :  { %v1592_v28 = vpack.c.bf16 %v424_v22, %v416_v21  ;;  %v513_v21 = vld [vmem:[#allocation5 + $0xe28] sm:$0xff]  ;;  %v1358_v25 = vpack.c.bf16 %v265_v20, %v257_v19  ;;  %v56_v19 = vld [vmem:[#allocation2 + $0x20] sm:$0xff] }
 0x141   :  { %v521_v22 = vld [vmem:[#allocation5 + $0xe68] sm:$0xff] }
 0x142   :  { %v1614_v26 = vpack.c.bf16 %v521_v22, %v513_v21 }
 0x143   :  { %1317 = vmatpush1.bf16.xpose.msra.mxu0 %v1316_v31  ;;  %v176_v31 = vld [vmem:[#allocation5 + $0x3a0] sm:$0xff] }
 0x144   :  { %1319 = vmatprep.subr.bf16.mxu0 %v1318_v33  ;;  %v432_v33 = vld [vmem:[#allocation5 + $0xba0] sm:$0xff] }
 0x145   :  { %1573 = vmatpush1.bf16.xpose.msra.mxu1 %v1572_v32  ;;  %v184_v32 = vld [vmem:[#allocation5 + $0x3e0] sm:$0xff] }
 0x146   :  { %1575 = vmatprep.subr.bf16.mxu1 %v1574_v34  ;;  %v440_v34 = vld [vmem:[#allocation5 + $0xbe0] sm:$0xff]  ;;  %v1340_v39 = vpack.c.bf16 %v184_v32, %v176_v31  ;;  %v273_v31 = vld [vmem:[#allocation5 + $0x6a8] sm:$0xff] }
 0x147   :  { %v1596_v40 = vpack.c.bf16 %v440_v34, %v432_v33  ;;  %v281_v32 = vld [vmem:[#allocation5 + $0x6e8] sm:$0xff] }
 0x148   :  { %v529_v33 = vld [vmem:[#allocation5 + $0xea8] sm:$0xff]  ;;  %v1362_v37 = vpack.c.bf16 %v281_v32, %v273_v31  ;;  %v355_v31 = vld [vmem:[#allocation5 + $0x938] sm:$0xff] }
 0x149   :  { %v537_v34 = vld [vmem:[#allocation5 + $0xee8] sm:$0xff]  ;;  %v363_v32 = vld [vmem:[#allocation5 + $0x978] sm:$0xff] }
 0x14a   :  { %v1618_v38 = vpack.c.bf16 %v537_v34, %v529_v33 }
 0x14b   :  { %1321 = vmatpush1.bf16.xpose.msra.mxu0 %v1320_v43  ;;  %v192_v43 = vld [vmem:[#allocation5 + $0x420] sm:$0xff] }
 0x14c   :  { %1323 = vmatprep.subr.bf16.mxu0 %v1322_v45  ;;  %v448_v45 = vld [vmem:[#allocation5 + $0xc20] sm:$0xff] }
 0x14d   :  { %1577 = vmatpush1.bf16.xpose.msra.mxu1 %v1576_v44  ;;  %v200_v44 = vld [vmem:[#allocation5 + $0x460] sm:$0xff] }
 0x14e   :  { %1579 = vmatprep.subr.bf16.mxu1 %v1578_v46  ;;  %v456_v46 = vld [vmem:[#allocation5 + $0xc60] sm:$0xff]  ;;  %v1344_v51 = vpack.c.bf16 %v200_v44, %v192_v43  ;;  %v289_v43 = vld [vmem:[#allocation5 + $0x728] sm:$0xff] }
 0x14f   :  { %v1600_v52 = vpack.c.bf16 %v456_v46, %v448_v45  ;;  %v297_v44 = vld [vmem:[#allocation5 + $0x768] sm:$0xff] }
 0x150   :  { %v545_v45 = vld [vmem:[#allocation5 + $0xf28] sm:$0xff]  ;;  %v1366_v49 = vpack.c.bf16 %v297_v44, %v289_v43  ;;  %v371_v43 = vld [vmem:[#allocation5 + $0x9b8] sm:$0xff] }
 0x151   :  { %v553_v46 = vld [vmem:[#allocation5 + $0xf68] sm:$0xff]  ;;  %v379_v44 = vld [vmem:[#allocation5 + $0x9f8] sm:$0xff] }
 0x152   :  { %v1622_v50 = vpack.c.bf16 %v553_v46, %v545_v45 }
 0x153   :  { %1325 = vmatpush1.bf16.xpose.msra.mxu0 %v1324_v55  ;;  %v208_v55 = vld [vmem:[#allocation5 + $0x4a0] sm:$0xff] }
 0x154   :  { %1327 = vmatprep.subr.bf16.mxu0 %v1326_v57  ;;  %v464_v57 = vld [vmem:[#allocation5 + $0xca0] sm:$0xff] }
 0x155   :  { %1581 = vmatpush1.bf16.xpose.msra.mxu1 %v1580_v56  ;;  %v216_v56 = vld [vmem:[#allocation5 + $0x4e0] sm:$0xff] }
 0x156   :  { %1583 = vmatprep.subr.bf16.mxu1 %v1582_v58  ;;  %v472_v58 = vld [vmem:[#allocation5 + $0xce0] sm:$0xff]  ;;  %v1348_v63 = vpack.c.bf16 %v216_v56, %v208_v55  ;;  %v305_v55 = vld [vmem:[#allocation5 + $0x7a8] sm:$0xff] }
 0x157   :  { %v1604_v0 = vpack.c.bf16 %v472_v58, %v464_v57  ;;  %v313_v56 = vld [vmem:[#allocation5 + $0x7e8] sm:$0xff] }
 0x158   :  { %v561_v57 = vld [vmem:[#allocation5 + $0xfa8] sm:$0xff]  ;;  %v1370_v61 = vpack.c.bf16 %v313_v56, %v305_v55  ;;  %v387_v55 = vld [vmem:[#allocation5 + $0xa38] sm:$0xff] }
 0x159   :  { %v569_v58 = vld [vmem:[#allocation5 + $0xfe8] sm:$0xff]  ;;  %v395_v56 = vld [vmem:[#allocation5 + $0xa78] sm:$0xff] }
 0x15a   :  { %v1626_v62 = vpack.c.bf16 %v569_v58, %v561_v57 }
 0x15b   :  { %1329 = vmatpush1.bf16.xpose.msra.mxu0 %v1328_v3  ;;  %v224_v3 = vld [vmem:[#allocation5 + $0x520] sm:$0xff] }
 0x15c   :  { %1331 = vmatprep.subr.bf16.mxu0 %v1330_v5  ;;  %v480_v5 = vld [vmem:[#allocation5 + $0xd20] sm:$0xff] }
 0x15d   :  { %1585 = vmatpush1.bf16.xpose.msra.mxu1 %v1584_v4  ;;  %v232_v4 = vld [vmem:[#allocation5 + $0x560] sm:$0xff] }
 0x15e   :  { %1587 = vmatprep.subr.bf16.mxu1 %v1586_v6  ;;  %v488_v6 = vld [vmem:[#allocation5 + $0xd60] sm:$0xff]  ;;  %v1352_v11 = vpack.c.bf16 %v232_v4, %v224_v3  ;;  %v67_v3 = vld [vmem:[#allocation5 + $0x38] sm:$0xff] }
 0x15f   :  { %v1608_v12 = vpack.c.bf16 %v488_v6, %v480_v5  ;;  %v75_v4 = vld [vmem:[#allocation5 + $0x78] sm:$0xff] }
 0x160   :  { %v323_v5 = vld [vmem:[#allocation5 + $0x838] sm:$0xff]  ;;  %v1374_v9 = vpack.c.bf16 %v75_v4, %v67_v3 }
 0x161   :  { %v331_v6 = vld [vmem:[#allocation5 + $0x878] sm:$0xff] }
 0x162   :  { %v1630_v10 = vpack.c.bf16 %v331_v6, %v323_v5  ;;  %v403_v3 = vld [vmem:[#allocation5 + $0xab8] sm:$0xff] }
 0x163   :  { %1333 = vmatpush1.bf16.xpose.msra.mxu0 %v1332_v15  ;;  %v240_v15 = vld [vmem:[#allocation5 + $0x5a0] sm:$0xff]  ;;  %v411_v4 = vld [vmem:[#allocation5 + $0xaf8] sm:$0xff] }
 0x164   :  { %1335 = vmatprep.subr.bf16.mxu0 %v1334_v17  ;;  %v496_v17 = vld [vmem:[#allocation5 + $0xda0] sm:$0xff] }
 0x165   :  { %1589 = vmatpush1.bf16.xpose.msra.mxu1 %v1588_v16  ;;  %v248_v16 = vld [vmem:[#allocation5 + $0x5e0] sm:$0xff] }
 0x166   :  { %1591 = vmatprep.subr.bf16.mxu1 %v1590_v18  ;;  %v504_v18 = vld [vmem:[#allocation5 + $0xde0] sm:$0xff]  ;;  %v1356_v23 = vpack.c.bf16 %v248_v16, %v240_v15  ;;  %v83_v15 = vld [vmem:[#allocation5 + $0xb8] sm:$0xff] }
 0x167   :  { %v1612_v24 = vpack.c.bf16 %v504_v18, %v496_v17  ;;  %v91_v16 = vld [vmem:[#allocation5 + $0xf8] sm:$0xff] }
 0x168   :  { %v339_v17 = vld [vmem:[#allocation5 + $0x8b8] sm:$0xff]  ;;  %v1378_v22 = vpack.c.bf16 %v91_v16, %v83_v15 }
 0x169   :  { %v347_v18 = vld [vmem:[#allocation5 + $0x8f8] sm:$0xff] }
 0x16a   :  { %v419_v15 = vld [vmem:[#allocation5 + $0xb38] sm:$0xff] }
 0x16b   :  { %1337 = vmatpush1.bf16.xpose.msra.mxu0 %v1336_v27  ;;  %v256_v27 = vld [vmem:[#allocation5 + $0x620] sm:$0xff]  ;;  %v427_v16 = vld [vmem:[#allocation5 + $0xb78] sm:$0xff] }
 0x16c   :  { %1339 = vmatprep.subr.bf16.mxu0 %v1338_v29  ;;  %v512_v29 = vld [vmem:[#allocation5 + $0xe20] sm:$0xff] }
 0x16d   :  { %1593 = vmatpush1.bf16.xpose.msra.mxu1 %v1592_v28  ;;  %v264_v28 = vld [vmem:[#allocation5 + $0x660] sm:$0xff] }
 0x16e   :  { %1595 = vmatprep.subr.bf16.mxu1 %v1594_v30  ;;  %v520_v30 = vld [vmem:[#allocation5 + $0xe60] sm:$0xff]  ;;  %v1360_v35 = vpack.c.bf16 %v264_v28, %v256_v27  ;;  %v338_v27 = vld [vmem:[#allocation5 + $0x8b0] sm:$0xff] }
 0x16f   :  { %v1616_v36 = vpack.c.bf16 %v520_v30, %v512_v29  ;;  %v346_v28 = vld [vmem:[#allocation5 + $0x8f0] sm:$0xff]  ;;  %v99_v29 = vld [vmem:[#allocation5 + $0x138] sm:$0xff] }
 0x170   :  { %v107_v30 = vld [vmem:[#allocation5 + $0x178] sm:$0xff]  ;;  %v1636_v34 = vpack.c.bf16 %v346_v28, %v338_v27 }
 0x171   :  { %v435_v27 = vld [vmem:[#allocation5 + $0xbb8] sm:$0xff] }
 0x172   :  { %v443_v28 = vld [vmem:[#allocation5 + $0xbf8] sm:$0xff] }
 0x173   :  { %1341 = vmatpush1.bf16.xpose.msra.mxu0 %v1340_v39  ;;  %v272_v39 = vld [vmem:[#allocation5 + $0x6a0] sm:$0xff] }
 0x174   :  { %1343 = vmatprep.subr.bf16.mxu0 %v1342_v41  ;;  %v528_v41 = vld [vmem:[#allocation5 + $0xea0] sm:$0xff] }
 0x175   :  { %1597 = vmatpush1.bf16.xpose.msra.mxu1 %v1596_v40  ;;  %v280_v40 = vld [vmem:[#allocation5 + $0x6e0] sm:$0xff] }
 0x176   :  { %1599 = vmatprep.subr.bf16.mxu1 %v1598_v42  ;;  %v536_v42 = vld [vmem:[#allocation5 + $0xee0] sm:$0xff]  ;;  %v1364_v47 = vpack.c.bf16 %v280_v40, %v272_v39  ;;  %v354_v39 = vld [vmem:[#allocation5 + $0x930] sm:$0xff] }
 0x177   :  { %v1620_v48 = vpack.c.bf16 %v536_v42, %v528_v41  ;;  %v362_v40 = vld [vmem:[#allocation5 + $0x970] sm:$0xff]  ;;  %v115_v41 = vld [vmem:[#allocation5 + $0x1b8] sm:$0xff] }
 0x178   :  { %v123_v42 = vld [vmem:[#allocation5 + $0x1f8] sm:$0xff]  ;;  %v1640_v46 = vpack.c.bf16 %v362_v40, %v354_v39 }
 0x179   :  { %v451_v39 = vld [vmem:[#allocation5 + $0xc38] sm:$0xff] }
 0x17a   :  { %v459_v40 = vld [vmem:[#allocation5 + $0xc78] sm:$0xff] }
 0x17b   :  { %1345 = vmatpush1.bf16.xpose.msra.mxu0 %v1344_v51  ;;  %v288_v51 = vld [vmem:[#allocation5 + $0x720] sm:$0xff] }
 0x17c   :  { %1347 = vmatprep.subr.bf16.mxu0 %v1346_v53  ;;  %v544_v53 = vld [vmem:[#allocation5 + $0xf20] sm:$0xff] }
 0x17d   :  { %1601 = vmatpush1.bf16.xpose.msra.mxu1 %v1600_v52  ;;  %v296_v52 = vld [vmem:[#allocation5 + $0x760] sm:$0xff] }
 0x17e   :  { %1603 = vmatprep.subr.bf16.mxu1 %v1602_v54  ;;  %v552_v54 = vld [vmem:[#allocation5 + $0xf60] sm:$0xff]  ;;  %v1368_v59 = vpack.c.bf16 %v296_v52, %v288_v51  ;;  %v370_v51 = vld [vmem:[#allocation5 + $0x9b0] sm:$0xff] }
 0x17f   :  { %v1624_v60 = vpack.c.bf16 %v552_v54, %v544_v53  ;;  %v378_v52 = vld [vmem:[#allocation5 + $0x9f0] sm:$0xff]  ;;  %v131_v53 = vld [vmem:[#allocation5 + $0x238] sm:$0xff] }
 0x180   :  { %v139_v54 = vld [vmem:[#allocation5 + $0x278] sm:$0xff]  ;;  %v1644_v58 = vpack.c.bf16 %v378_v52, %v370_v51 }
 0x181   :  { %v467_v51 = vld [vmem:[#allocation5 + $0xcb8] sm:$0xff] }
 0x182   :  { %v475_v52 = vld [vmem:[#allocation5 + $0xcf8] sm:$0xff] }
 0x183   :  { %1349 = vmatpush1.bf16.xpose.msra.mxu0 %v1348_v63  ;;  %v304_v63 = vld [vmem:[#allocation5 + $0x7a0] sm:$0xff] }
 0x184   :  { %1351 = vmatprep.subr.bf16.mxu0 %v1350_v1  ;;  %v560_v1 = vld [vmem:[#allocation5 + $0xfa0] sm:$0xff] }
 0x185   :  { %1605 = vmatpush1.bf16.xpose.msra.mxu1 %v1604_v0  ;;  %v312_v0 = vld [vmem:[#allocation5 + $0x7e0] sm:$0xff] }
 0x186   :  { %1607 = vmatprep.subr.bf16.mxu1 %v1606_v2  ;;  %v568_v2 = vld [vmem:[#allocation5 + $0xfe0] sm:$0xff]  ;;  %v1372_v7 = vpack.c.bf16 %v312_v0, %v304_v63  ;;  %v386_v63 = vld [vmem:[#allocation5 + $0xa30] sm:$0xff] }
 0x187   :  { %v1628_v8 = vpack.c.bf16 %v568_v2, %v560_v1  ;;  %v394_v0 = vld [vmem:[#allocation5 + $0xa70] sm:$0xff]  ;;  %v147_v1 = vld [vmem:[#allocation5 + $0x2b8] sm:$0xff] }
 0x188   :  { %v155_v2 = vld [vmem:[#allocation5 + $0x2f8] sm:$0xff]  ;;  %v1648_v6 = vpack.c.bf16 %v394_v0, %v386_v63 }
 0x189   :  { %v483_v63 = vld [vmem:[#allocation5 + $0xd38] sm:$0xff] }
 0x18a   :  { %v491_v0 = vld [vmem:[#allocation5 + $0xd78] sm:$0xff] }
 0x18b   :  { %1353 = vmatpush1.bf16.xpose.msra.mxu0 %v1352_v11  ;;  %v66_v11 = vld [vmem:[#allocation5 + $0x30] sm:$0xff] }
 0x18c   :  { %1355 = vmatprep.subr.bf16.mxu0 %v1354_v13  ;;  %v322_v13 = vld [vmem:[#allocation5 + $0x830] sm:$0xff] }
 0x18d   :  { %1609 = vmatpush1.bf16.xpose.msra.mxu1 %v1608_v12  ;;  %v74_v12 = vld [vmem:[#allocation5 + $0x70] sm:$0xff] }
 0x18e   :  { %1611 = vmatprep.subr.bf16.mxu1 %v1610_v14  ;;  %v330_v14 = vld [vmem:[#allocation5 + $0x870] sm:$0xff]  ;;  %v1376_v20 = vpack.c.bf16 %v74_v12, %v66_v11 }
 0x18f   :  { %v1632_v21 = vpack.c.bf16 %v330_v14, %v322_v13  ;;  %v402_v11 = vld [vmem:[#allocation5 + $0xab0] sm:$0xff]  ;;  %v163_v13 = vld [vmem:[#allocation5 + $0x338] sm:$0xff] }
 0x190   :  { %v410_v12 = vld [vmem:[#allocation5 + $0xaf0] sm:$0xff]  ;;  %v171_v14 = vld [vmem:[#allocation5 + $0x378] sm:$0xff] }
 0x193   :  { %1357 = vmatpush1.bf16.xpose.msra.mxu0 %v1356_v23  ;;  %v1634_v23 = vpack.c.bf16 %v347_v18, %v339_v17  ;;  %v1652_v18 = vpack.c.bf16 %v410_v12, %v402_v11  ;;  %v499_v11 = vld [vmem:[#allocation5 + $0xdb8] sm:$0xff] }
 0x194   :  { %1359 = vmatprep.subr.bf16.mxu0 %v1358_v25  ;;  %v82_v25 = vld [vmem:[#allocation5 + $0xb0] sm:$0xff]  ;;  %v507_v12 = vld [vmem:[#allocation5 + $0xdf8] sm:$0xff] }
 0x195   :  { %1613 = vmatpush1.bf16.xpose.msra.mxu1 %v1612_v24  ;;  %v59_v24 = vld [vmem:[#allocation2 + $0x38] sm:$0xff] }
 0x196   :  { %1615 = vmatprep.subr.bf16.mxu1 %v1614_v26  ;;  %v90_v26 = vld [vmem:[#allocation5 + $0xf0] sm:$0xff] }
 0x197   :  { %v1380_v33 = vpack.c.bf16 %v90_v26, %v82_v25  ;;  %v179_v25 = vld [vmem:[#allocation5 + $0x3b8] sm:$0xff] }
 0x198   :  { %v187_v26 = vld [vmem:[#allocation5 + $0x3f8] sm:$0xff] }
 0x19b   :  { %1361 = vmatpush1.bf16.xpose.msra.mxu0 %v1360_v35  ;;  %v1382_v35 = vpack.c.bf16 %v107_v30, %v99_v29 }
 0x19c   :  { %1363 = vmatprep.subr.bf16.mxu0 %v1362_v37  ;;  %v98_v37 = vld [vmem:[#allocation5 + $0x130] sm:$0xff] }
 0x19d   :  { %1617 = vmatpush1.bf16.xpose.msra.mxu1 %v1616_v36  ;;  %v1638_v36 = vpack.c.bf16 %v363_v32, %v355_v31  ;;  %v1402_v31 = vpack.c.bf16 %v187_v26, %v179_v25  ;;  %v1658_v32 = vpack.c.bf16 %v443_v28, %v435_v27 }
 0x19e   :  { %1619 = vmatprep.subr.bf16.mxu1 %v1618_v38  ;;  %v106_v38 = vld [vmem:[#allocation5 + $0x170] sm:$0xff] }
 0x19f   :  { %v1384_v45 = vpack.c.bf16 %v106_v38, %v98_v37  ;;  %v195_v37 = vld [vmem:[#allocation5 + $0x438] sm:$0xff] }
 0x1a0   :  { %v203_v38 = vld [vmem:[#allocation5 + $0x478] sm:$0xff] }
 0x1a3   :  { %1365 = vmatpush1.bf16.xpose.msra.mxu0 %v1364_v47  ;;  %v1386_v47 = vpack.c.bf16 %v123_v42, %v115_v41 }
 0x1a4   :  { %1367 = vmatprep.subr.bf16.mxu0 %v1366_v49  ;;  %v114_v49 = vld [vmem:[#allocation5 + $0x1b0] sm:$0xff] }
 0x1a5   :  { %1621 = vmatpush1.bf16.xpose.msra.mxu1 %v1620_v48  ;;  %v1642_v48 = vpack.c.bf16 %v379_v44, %v371_v43  ;;  %v1406_v43 = vpack.c.bf16 %v203_v38, %v195_v37  ;;  %v1662_v44 = vpack.c.bf16 %v459_v40, %v451_v39 }
 0x1a6   :  { %1623 = vmatprep.subr.bf16.mxu1 %v1622_v50  ;;  %v122_v50 = vld [vmem:[#allocation5 + $0x1f0] sm:$0xff] }
 0x1a7   :  { %v1388_v57 = vpack.c.bf16 %v122_v50, %v114_v49  ;;  %v211_v49 = vld [vmem:[#allocation5 + $0x4b8] sm:$0xff] }
 0x1a8   :  { %v219_v50 = vld [vmem:[#allocation5 + $0x4f8] sm:$0xff] }
 0x1ab   :  { %1369 = vmatpush1.bf16.xpose.msra.mxu0 %v1368_v59  ;;  %v1390_v59 = vpack.c.bf16 %v139_v54, %v131_v53 }
 0x1ac   :  { %1371 = vmatprep.subr.bf16.mxu0 %v1370_v61  ;;  %v130_v61 = vld [vmem:[#allocation5 + $0x230] sm:$0xff] }
 0x1ad   :  { %1625 = vmatpush1.bf16.xpose.msra.mxu1 %v1624_v60  ;;  %v1646_v60 = vpack.c.bf16 %v395_v56, %v387_v55  ;;  %v1410_v55 = vpack.c.bf16 %v219_v50, %v211_v49  ;;  %v1666_v56 = vpack.c.bf16 %v475_v52, %v467_v51 }
 0x1ae   :  { %1627 = vmatprep.subr.bf16.mxu1 %v1626_v62  ;;  %v138_v62 = vld [vmem:[#allocation5 + $0x270] sm:$0xff] }
 0x1af   :  { %v1392_v5 = vpack.c.bf16 %v138_v62, %v130_v61  ;;  %v227_v61 = vld [vmem:[#allocation5 + $0x538] sm:$0xff] }
 0x1b0   :  { %v235_v62 = vld [vmem:[#allocation5 + $0x578] sm:$0xff] }
 0x1b3   :  { %1373 = vmatpush1.bf16.xpose.msra.mxu0 %v1372_v7  ;;  %v1394_v7 = vpack.c.bf16 %v155_v2, %v147_v1 }
 0x1b4   :  { %1375 = vmatprep.subr.bf16.mxu0 %v1374_v9  ;;  %v146_v9 = vld [vmem:[#allocation5 + $0x2b0] sm:$0xff] }
 0x1b5   :  { %1629 = vmatpush1.bf16.xpose.msra.mxu1 %v1628_v8  ;;  %v1650_v8 = vpack.c.bf16 %v411_v4, %v403_v3  ;;  %v1414_v3 = vpack.c.bf16 %v235_v62, %v227_v61  ;;  %v1670_v4 = vpack.c.bf16 %v491_v0, %v483_v63 }
 0x1b6   :  { %1631 = vmatprep.subr.bf16.mxu1 %v1630_v10  ;;  %v154_v10 = vld [vmem:[#allocation5 + $0x2f0] sm:$0xff] }
 0x1b7   :  { %v1396_v17 = vpack.c.bf16 %v154_v10, %v146_v9  ;;  %v243_v9 = vld [vmem:[#allocation5 + $0x5b8] sm:$0xff] }
 0x1b8   :  { %v251_v10 = vld [vmem:[#allocation5 + $0x5f8] sm:$0xff] }
 0x1ba   :  { %801 = vmatmul.mubr.f32.vlgmr.msra.gmra.mrb[0].mxu0 %v56_v19 }
 0x1bb   :  { %1377 = vmatpush1.bf16.xpose.msra.mxu0 %v1376_v20  ;;  %871 = vmatprep.mubr.f32.mxu0 %v59_v24  ;;  %v1654_v20 = vpack.c.bf16 %v427_v16, %v419_v15  ;;  %v1418_v15 = vpack.c.bf16 %v251_v10, %v243_v9  ;;  %v1674_v16 = vpack.c.bf16 %v507_v12, %v499_v11  ;;  %v572_v11 = vld [vmem:[#allocation7] sm:$0xf] }
 0x1bc   :  { %1085 = vmatmul.mubr.f32.vlgmr.msra.gmra.mrb[0].mxu1 %v56_v19  ;;  %1379 = vmatprep.subr.bf16.mxu0 %v1378_v22  ;;  %v1398_v19 = vpack.c.bf16 %v171_v14, %v163_v13  ;;  %v170_v22 = vld [vmem:[#allocation5 + $0x370] sm:$0xff] }
 0x1bd   :  { %1633 = vmatpush1.bf16.xpose.msra.mxu1 %v1632_v21  ;;  %1155 = vmatprep.mubr.f32.mxu1 %v59_v24  ;;  %v162_v21 = vld [vmem:[#allocation5 + $0x330] sm:$0xff] }
 0x1be   :  { %1635 = vmatprep.subr.bf16.mxu1 %v1634_v23  ;;  %v418_v23 = vld [vmem:[#allocation5 + $0xb30] sm:$0xff]  ;;  %v1400_v29 = vpack.c.bf16 %v170_v22, %v162_v21  ;;  %v259_v21 = vld [vmem:[#allocation5 + $0x638] sm:$0xff] }
 0x1bf   :  { %v426_v24 = vld [vmem:[#allocation5 + $0xb70] sm:$0xff]  ;;  %v267_v22 = vld [vmem:[#allocation5 + $0x678] sm:$0xff] }
 0x1c0   :  { %v1656_v30 = vpack.c.bf16 %v426_v24, %v418_v23  ;;  %v515_v23 = vld [vmem:[#allocation5 + $0xe38] sm:$0xff]  ;;  %v1422_v27 = vpack.c.bf16 %v267_v22, %v259_v21 }
 0x1c1   :  { %v523_v24 = vld [vmem:[#allocation5 + $0xe78] sm:$0xff] }
 0x1c2   :  { %v1678_v28 = vpack.c.bf16 %v523_v24, %v515_v23 }
 0x1c3   :  { %1381 = vmatpush1.bf16.xpose.msra.mxu0 %v1380_v33  ;;  %v178_v33 = vld [vmem:[#allocation5 + $0x3b0] sm:$0xff] }
 0x1c4   :  { %1383 = vmatprep.subr.bf16.mxu0 %v1382_v35  ;;  %v434_v35 = vld [vmem:[#allocation5 + $0xbb0] sm:$0xff] }
 0x1c5   :  { %1637 = vmatpush1.bf16.xpose.msra.mxu1 %v1636_v34  ;;  %v186_v34 = vld [vmem:[#allocation5 + $0x3f0] sm:$0xff] }
 0x1c6   :  { %1639 = vmatprep.subr.bf16.mxu1 %v1638_v36  ;;  %v442_v36 = vld [vmem:[#allocation5 + $0xbf0] sm:$0xff]  ;;  %v1404_v41 = vpack.c.bf16 %v186_v34, %v178_v33  ;;  %v275_v33 = vld [vmem:[#allocation5 + $0x6b8] sm:$0xff] }
 0x1c7   :  { %v1660_v42 = vpack.c.bf16 %v442_v36, %v434_v35  ;;  %v283_v34 = vld [vmem:[#allocation5 + $0x6f8] sm:$0xff] }
 0x1c8   :  { %v531_v35 = vld [vmem:[#allocation5 + $0xeb8] sm:$0xff]  ;;  %v1426_v39 = vpack.c.bf16 %v283_v34, %v275_v33 }
 0x1c9   :  { %v539_v36 = vld [vmem:[#allocation5 + $0xef8] sm:$0xff] }
 0x1ca   :  { %v1682_v40 = vpack.c.bf16 %v539_v36, %v531_v35 }
 0x1cb   :  { %1385 = vmatpush1.bf16.xpose.msra.mxu0 %v1384_v45  ;;  %v194_v45 = vld [vmem:[#allocation5 + $0x430] sm:$0xff] }
 0x1cc   :  { %1387 = vmatprep.subr.bf16.mxu0 %v1386_v47  ;;  %v450_v47 = vld [vmem:[#allocation5 + $0xc30] sm:$0xff] }
 0x1cd   :  { %1641 = vmatpush1.bf16.xpose.msra.mxu1 %v1640_v46  ;;  %v202_v46 = vld [vmem:[#allocation5 + $0x470] sm:$0xff] }
 0x1ce   :  { %1643 = vmatprep.subr.bf16.mxu1 %v1642_v48  ;;  %v458_v48 = vld [vmem:[#allocation5 + $0xc70] sm:$0xff]  ;;  %v1408_v53 = vpack.c.bf16 %v202_v46, %v194_v45  ;;  %v291_v45 = vld [vmem:[#allocation5 + $0x738] sm:$0xff] }
 0x1cf   :  { %v1664_v54 = vpack.c.bf16 %v458_v48, %v450_v47  ;;  %v299_v46 = vld [vmem:[#allocation5 + $0x778] sm:$0xff] }
 0x1d0   :  { %v547_v47 = vld [vmem:[#allocation5 + $0xf38] sm:$0xff]  ;;  %v1430_v51 = vpack.c.bf16 %v299_v46, %v291_v45 }
 0x1d1   :  { %v555_v48 = vld [vmem:[#allocation5 + $0xf78] sm:$0xff] }
 0x1d2   :  { %v1686_v52 = vpack.c.bf16 %v555_v48, %v547_v47 }
 0x1d3   :  { %1389 = vmatpush1.bf16.xpose.msra.mxu0 %v1388_v57  ;;  %v210_v57 = vld [vmem:[#allocation5 + $0x4b0] sm:$0xff] }
 0x1d4   :  { %1391 = vmatprep.subr.bf16.mxu0 %v1390_v59  ;;  %v466_v59 = vld [vmem:[#allocation5 + $0xcb0] sm:$0xff] }
 0x1d5   :  { %1645 = vmatpush1.bf16.xpose.msra.mxu1 %v1644_v58  ;;  %v218_v58 = vld [vmem:[#allocation5 + $0x4f0] sm:$0xff] }
 0x1d6   :  { %1647 = vmatprep.subr.bf16.mxu1 %v1646_v60  ;;  %v474_v60 = vld [vmem:[#allocation5 + $0xcf0] sm:$0xff]  ;;  %v1412_v1 = vpack.c.bf16 %v218_v58, %v210_v57  ;;  %v307_v57 = vld [vmem:[#allocation5 + $0x7b8] sm:$0xff] }
 0x1d7   :  { %v1668_v2 = vpack.c.bf16 %v474_v60, %v466_v59  ;;  %v315_v58 = vld [vmem:[#allocation5 + $0x7f8] sm:$0xff] }
 0x1d8   :  { %v563_v59 = vld [vmem:[#allocation5 + $0xfb8] sm:$0xff]  ;;  %v1434_v63 = vpack.c.bf16 %v315_v58, %v307_v57 }
 0x1d9   :  { %v571_v60 = vld [vmem:[#allocation5 + $0xff8] sm:$0xff] }
 0x1da   :  { %v1690_v0 = vpack.c.bf16 %v571_v60, %v563_v59 }
 0x1db   :  { %1393 = vmatpush1.bf16.xpose.msra.mxu0 %v1392_v5  ;;  %v226_v5 = vld [vmem:[#allocation5 + $0x530] sm:$0xff] }
 0x1dc   :  { %1395 = vmatprep.subr.bf16.mxu0 %v1394_v7  ;;  %v482_v7 = vld [vmem:[#allocation5 + $0xd30] sm:$0xff] }
 0x1dd   :  { %1649 = vmatpush1.bf16.xpose.msra.mxu1 %v1648_v6  ;;  %v234_v6 = vld [vmem:[#allocation5 + $0x570] sm:$0xff] }
 0x1de   :  { %1651 = vmatprep.subr.bf16.mxu1 %v1650_v8  ;;  %v490_v8 = vld [vmem:[#allocation5 + $0xd70] sm:$0xff]  ;;  %v1416_v13 = vpack.c.bf16 %v234_v6, %v226_v5 }
 0x1df   :  { %v1672_v14 = vpack.c.bf16 %v490_v8, %v482_v7  ;;  %v58_v7 = vld [vmem:[#allocation2 + $0x30] sm:$0xff]  ;;  %v574_v8 = vlaneseq }
 0x1e1   :  { %v575_v9 = vshrl.u32 %v574_v8, 7 }
 0x1e3   :  { %1397 = vmatpush1.bf16.xpose.msra.mxu0 %v1396_v17  ;;  %v242_v17 = vld [vmem:[#allocation5 + $0x5b0] sm:$0xff]  ;;  %v576_v10 = vsub.s32 0, %v575_v9  ;;  %v584_v12 = vsub.s32 2, %v575_v9 }
 0x1e4   :  { %1399 = vmatprep.subr.bf16.mxu0 %v1398_v19  ;;  %v498_v19 = vld [vmem:[#allocation5 + $0xdb0] sm:$0xff] }
 0x1e5   :  { %1653 = vmatpush1.bf16.xpose.msra.mxu1 %v1652_v18  ;;  %v250_v18 = vld [vmem:[#allocation5 + $0x5f0] sm:$0xff] }
 0x1e6   :  { %1655 = vmatprep.subr.bf16.mxu1 %v1654_v20  ;;  %v506_v20 = vld [vmem:[#allocation5 + $0xdf0] sm:$0xff]  ;;  %v1420_v25 = vpack.c.bf16 %v250_v18, %v242_v17 }
 0x1e7   :  { %v1676_v26 = vpack.c.bf16 %v506_v20, %v498_v19 }
 0x1eb   :  { %1401 = vmatpush1.bf16.xpose.msra.mxu0 %v1400_v29  ;;  %v258_v29 = vld [vmem:[#allocation5 + $0x630] sm:$0xff] }
 0x1ec   :  { %1403 = vmatprep.subr.bf16.mxu0 %v1402_v31  ;;  %v514_v31 = vld [vmem:[#allocation5 + $0xe30] sm:$0xff] }
 0x1ed   :  { %1657 = vmatpush1.bf16.xpose.msra.mxu1 %v1656_v30  ;;  %v266_v30 = vld [vmem:[#allocation5 + $0x670] sm:$0xff] }
 0x1ee   :  { %1659 = vmatprep.subr.bf16.mxu1 %v1658_v32  ;;  %v522_v32 = vld [vmem:[#allocation5 + $0xe70] sm:$0xff]  ;;  %v1424_v37 = vpack.c.bf16 %v266_v30, %v258_v29 }
 0x1ef   :  { %v1680_v38 = vpack.c.bf16 %v522_v32, %v514_v31 }
 0x1f3   :  { %1405 = vmatpush1.bf16.xpose.msra.mxu0 %v1404_v41  ;;  %v274_v41 = vld [vmem:[#allocation5 + $0x6b0] sm:$0xff] }
 0x1f4   :  { %1407 = vmatprep.subr.bf16.mxu0 %v1406_v43  ;;  %v530_v43 = vld [vmem:[#allocation5 + $0xeb0] sm:$0xff] }
 0x1f5   :  { %1661 = vmatpush1.bf16.xpose.msra.mxu1 %v1660_v42  ;;  %v282_v42 = vld [vmem:[#allocation5 + $0x6f0] sm:$0xff] }
 0x1f6   :  { %1663 = vmatprep.subr.bf16.mxu1 %v1662_v44  ;;  %v538_v44 = vld [vmem:[#allocation5 + $0xef0] sm:$0xff]  ;;  %v1428_v49 = vpack.c.bf16 %v282_v42, %v274_v41 }
 0x1f7   :  { %v1684_v50 = vpack.c.bf16 %v538_v44, %v530_v43 }
 0x1fb   :  { %1409 = vmatpush1.bf16.xpose.msra.mxu0 %v1408_v53  ;;  %v290_v53 = vld [vmem:[#allocation5 + $0x730] sm:$0xff] }
 0x1fc   :  { %1411 = vmatprep.subr.bf16.mxu0 %v1410_v55  ;;  %v546_v55 = vld [vmem:[#allocation5 + $0xf30] sm:$0xff] }
 0x1fd   :  { %1665 = vmatpush1.bf16.xpose.msra.mxu1 %v1664_v54  ;;  %v298_v54 = vld [vmem:[#allocation5 + $0x770] sm:$0xff] }
 0x1fe   :  { %1667 = vmatprep.subr.bf16.mxu1 %v1666_v56  ;;  %v554_v56 = vld [vmem:[#allocation5 + $0xf70] sm:$0xff]  ;;  %v1432_v61 = vpack.c.bf16 %v298_v54, %v290_v53 }
 0x1ff   :  { %v1688_v62 = vpack.c.bf16 %v554_v56, %v546_v55 }
 0x203   :  { %1413 = vmatpush1.bf16.xpose.msra.mxu0 %v1412_v1  ;;  %v306_v1 = vld [vmem:[#allocation5 + $0x7b0] sm:$0xff] }
 0x204   :  { %1415 = vmatprep.subr.bf16.mxu0 %v1414_v3  ;;  %v562_v3 = vld [vmem:[#allocation5 + $0xfb0] sm:$0xff] }
 0x205   :  { %1669 = vmatpush1.bf16.xpose.msra.mxu1 %v1668_v2  ;;  %v314_v2 = vld [vmem:[#allocation5 + $0x7f0] sm:$0xff] }
 0x206   :  { %1671 = vmatprep.subr.bf16.mxu1 %v1670_v4  ;;  %v570_v4 = vld [vmem:[#allocation5 + $0xff0] sm:$0xff]  ;;  %v1436_v5 = vpack.c.bf16 %v314_v2, %v306_v1 }
 0x207   :  { %v1692_v6 = vpack.c.bf16 %v570_v4, %v562_v3 }
 0x20b   :  { %1417 = vmatpush1.bf16.xpose.msra.mxu0 %v1416_v13  ;;  %v580_v13 = vsub.s32 1, %v575_v9 }
 0x20c   :  { %1419 = vmatprep.subr.bf16.mxu0 %v1418_v15  ;;  %v577_v15 = vrot.slane %v572_v11, %v576_v10 }
 0x20d   :  { %1673 = vmatpush1.bf16.xpose.msra.mxu1 %v1672_v14  ;;  %v588_v14 = vsub.s32 3, %v575_v9  ;;  %v581_v17 = vrot.slane %v572_v11, %v580_v13 }
 0x20e   :  { %1675 = vmatprep.subr.bf16.mxu1 %v1674_v16  ;;  %v585_v16 = vrot.slane %v572_v11, %v584_v12 }
 0x20f   :  { %v589_v18 = vrot.slane %v572_v11, %v588_v14 }
 0x213   :  { %1421 = vmatpush1.bf16.xpose.msra.mxu0 %v1420_v25 }
 0x214   :  { %1423 = vmatprep.subr.bf16.mxu0 %v1422_v27 }
 0x215   :  { %1677 = vmatpush1.bf16.xpose.msra.mxu1 %v1676_v26 }
 0x216   :  { %1679 = vmatprep.subr.bf16.mxu1 %v1678_v28 }
 0x21b   :  { %1425 = vmatpush1.bf16.xpose.msra.mxu0 %v1424_v37 }
 0x21c   :  { %1427 = vmatprep.subr.bf16.mxu0 %v1426_v39 }
 0x21d   :  { %1681 = vmatpush1.bf16.xpose.msra.mxu1 %v1680_v38 }
 0x21e   :  { %1683 = vmatprep.subr.bf16.mxu1 %v1682_v40 }
 0x223   :  { %1429 = vmatpush1.bf16.xpose.msra.mxu0 %v1428_v49 }
 0x224   :  { %1431 = vmatprep.subr.bf16.mxu0 %v1430_v51 }
 0x225   :  { %1685 = vmatpush1.bf16.xpose.msra.mxu1 %v1684_v50 }
 0x226   :  { %1687 = vmatprep.subr.bf16.mxu1 %v1686_v52 }
 0x22b   :  { %1433 = vmatpush1.bf16.xpose.msra.mxu0 %v1432_v61 }
 0x22c   :  { %1435 = vmatprep.subr.bf16.mxu0 %v1434_v63 }
 0x22d   :  { %1689 = vmatpush1.bf16.xpose.msra.mxu1 %v1688_v62 }
 0x22e   :  { %1691 = vmatprep.subr.bf16.mxu1 %v1690_v0 }
 0x233   :  { %1437 = vmatpush1.bf16.xpose.msra.mxu0 %v1436_v5 }
 0x235   :  { %1693 = vmatpush1.bf16.xpose.msra.mxu1 %v1692_v6 }
 0x23a   :  { %872 = vmatmul.mubr.f32.vlgmr.msra.gmra.mrb[0].mxu0 %v58_v7 }
 0x23c   :  { %1156 = vmatmul.mubr.f32.vlgmr.msra.gmra.mrb[0].mxu1 %v58_v7 }
 0x30d   :  { %v873_v19 = vpop.f32.mrb[0].mxu0 }
 0x30e   :  { %v1694_v20 = vadd.f32 %v873_v19, %v577_v15  ;;  %v875_v22 = vpop.f32.mrb[1].mxu0 }
 0x30f   :  { %v1157_v21 = vpop.f32.mrb[0].mxu1  ;;  %v1695_v24 = vadd.f32 %v875_v22, %v581_v17 }
 0x310   :  { %v1696_v23 = vadd.f32 %v1157_v21, %v585_v16  ;;  %v1159_v25 = vpop.f32.mrb[1].mxu1  ;;  %1162 = vst [vmem:[#allocation8] sm:$0xff] %v1694_v20 }
 0x311   :  { %v1697_v26 = vadd.f32 %v1159_v25, %v589_v18  ;;  %1163 = vst [vmem:[#allocation8 + $0x8] sm:$0xff] %v1695_v24 }
 0x312   :  { %1164 = vst [vmem:[#allocation8 + $0x10] sm:$0xff] %v1696_v23 }
 0x313   :  { %1165 = vst [vmem:[#allocation8 + $0x18] sm:$0xff] %v1697_v26 }
 0x314   :  { %1793 = shalt.err (!%p1790_p0)
}
 0x315   :  { %s1794_s25 = scalar_lea.hbm %s1887_s3, 512 }
 0x316   :  { %p1795_p1 = scmp.ne.s32.totalorder %s1887_s3, %s1794_s25  ;;  %p1798_p2 = scmp.lt.u32.totalorder %s1794_s25, %s1887_s3 }
 0x318   :  { %p1800_p3 = pnand %p1798_p2, %p1795_p1 }
 0x31a   :  { %1803 = shalt.err (!%p1800_p3)
}
 0x31b   :  { %1175 = dma.vmem_to_hbm [thread:$0]  %s1173_s21, 512, %s1887_s3, [#allocation4]  }
 0x31c   :  { %1808 = dma.done.wait [#allocation4], 512  }
 0x31d   :  { %1809 = vsyncadd [#allocation4], 4294966784 }
 0x31e   :  { %1179 = vsyncpa [#allocation3], 1 }
 0x31f   :  { %1180 = vsyncpa [#allocation6], 1 }
 0x320   :  { %1181 = vsyncpa [#allocation4], 1 }

</bundles_post_ra>
